<compile_context>
chip_gen: v7x
topology: tpu7x:2x2x1
jax: 0.10.0
libtpu: 0.0.40
codegen_flags: <defaults>
</compile_context>

<pallas_src>
import functools

import numpy as np
import jax
import jax.numpy as jnp
from jax.experimental import pallas as pl
from jax.experimental.pallas import tpu as pltpu


# ----------------------------------------------------------------------------
# Fused kernel: im2col-matmul head  +  YOLO transform  +  per-image loss partials
# ----------------------------------------------------------------------------
def fused_yolo_head_kernel(patch_ref, w1_ref, b1_ref, w2_ref, b2_ref,
                           grid_ref, mask_ref, out_ref, loss_ref, *, Nb, GG, AD):
    R = Nb * GG
    K1 = patch_ref.shape[-1]

    # ---- conv head: 3x3 conv (im2col matmul) -> LeakyReLU -> 1x1 conv ----
    x = patch_ref[...].reshape(R, K1)                               # bf16
    h = jnp.dot(x, w1_ref[...], preferred_element_type=jnp.float32) + b1_ref[...]
    h = jnp.maximum(h, 0.1 * h)                                     # LeakyReLU(0.1)
    head = jnp.dot(h.astype(jnp.bfloat16), w2_ref[...],
                   preferred_element_type=jnp.float32) + b2_ref[...]
    head = head.reshape(Nb, GG, AD)                                 # f32

    # ---- per-column coefficient rows (precomputed constants, passed as input) ----
    is_wh = mask_ref[0:1, :].reshape(1, 1, AD)      # 1.0 on w/h columns, else 0
    wh_coeff = mask_ref[1:2, :].reshape(1, 1, AD)   # anchor w/h on w/h columns, else 0
    sig_coeff = mask_ref[2:3, :].reshape(1, 1, AD)  # stride on x/y, 1 on obj/cls, 0 on w/h
    grid_add = grid_ref[...].reshape(1, GG, AD)     # stride*(gx|gy) on x/y cols, else 0

    # ---- YOLO transform (pure VPU/EUP arithmetic, no selects, no iota) ----
    sig = jax.nn.sigmoid(head)
    # exp input is pre-masked to the w/h columns -> finite everywhere, no inf*0.
    wh = jnp.exp(head * is_wh) * wh_coeff
    out = sig * sig_coeff + grid_add + wh                           # (Nb, GG, AD)

    # Single lane-dense (24-lane) store per step.
    out_ref[...] = out

    # Per-image squared-sum partials over the spatial axis (reduced outside).
    loss_ref[0, :, :] = jnp.sum(out * out, axis=1)                  # (Nb, AD)


def run_fused_head(patches, w1, b1, w2, b2, grid_add, masks,
                   *, Nb, n_steps, GG, AD):
    K1 = patches.shape[-1]
    hidden = w1.shape[1]
    out_ch = w2.shape[1]
    kern = functools.partial(fused_yolo_head_kernel, Nb=Nb, GG=GG, AD=AD)
    return pl.pallas_call(
        kern,
        out_shape=(
            jax.ShapeDtypeStruct((n_steps * Nb, GG, AD), jnp.float32),
            jax.ShapeDtypeStruct((n_steps, Nb, AD), jnp.float32),
        ),
        grid_spec=pltpu.PrefetchScalarGridSpec(
            num_scalar_prefetch=0,
            grid=(n_steps,),                         # Nb images per step
            in_specs=[
                pl.BlockSpec((Nb, GG, K1), lambda n: (n, 0, 0)),
                pl.BlockSpec((K1, hidden), lambda n: (0, 0)),    # resident weights
                pl.BlockSpec((1, hidden), lambda n: (0, 0)),
                pl.BlockSpec((hidden, out_ch), lambda n: (0, 0)),
                pl.BlockSpec((1, out_ch), lambda n: (0, 0)),
                pl.BlockSpec((GG, AD), lambda n: (0, 0)),        # grid offsets (resident)
                pl.BlockSpec((8, AD), lambda n: (0, 0)),         # coeff rows (resident)
            ],
            out_specs=[
                pl.BlockSpec((Nb, GG, AD), lambda n: (n, 0, 0)),
                pl.BlockSpec((1, Nb, AD), lambda n: (n, 0, 0)),
            ],
        ),
        compiler_params=pltpu.CompilerParams(
            dimension_semantics=("parallel",)),      # megacore-splittable on v7x
    )(patches, w1, b1, w2, b2, grid_add, masks)


# ----------------------------------------------------------------------------
# Glue: im2col, parameter init, wrapper class
# ----------------------------------------------------------------------------
def im2col3x3(x_nhwc):
    """Extract 3x3 patches (pad=1, stride=1).  Returns (N, H*W, 9*C)."""
    # TODO(synk): at larger image_size/channels, move im2col inside the Pallas
    # kernel (DMA the padded tile once and accumulate 9 shifted matmuls) to
    # avoid materializing a 9x-expanded patches tensor in HBM.
    N, H, W, C = x_nhwc.shape
    xp = jnp.pad(x_nhwc, ((0, 0), (1, 1), (1, 1), (0, 0)))
    patches = []
    for dy in range(3):
        for dx in range(3):
            patches.append(xp[:, dy:dy + H, dx:dx + W, :])
    patches = jnp.concatenate(patches, axis=-1)   # (N, H, W, 9*C), (kh,kw,c) order
    return patches.reshape(N, H * W, 9 * C)


class YOLOMAMLPallas:
    """JAX/Pallas re-implementation of YOLOMAML.forward (with a tiny YOLO base)."""

    def __init__(self, n_way=3, n_support=1, n_query=2, image_size=16,
                 in_channels=4, hidden=32, num_anchors=3,
                 task_update_num=5, train_lr=0.01, seed=0):
        self.n_way = n_way
        self.n_support = n_support
        self.n_query = n_query
        self.image_size = image_size
        self.in_channels = in_channels
        self.hidden = hidden
        self.num_anchors = num_anchors
        self.task_update_num = task_update_num
        self.train_lr = train_lr
        self.box_dim = 5 + n_way

        key = jax.random.PRNGKey(seed)
        k1, k2, k3, k4 = jax.random.split(key, 4)
        K1 = 9 * in_channels
        out_ch = num_anchors * self.box_dim
        # Weight layouts: W1 corresponds to PyTorch conv weight (hidden, C, 3, 3)
        # permuted to (kh, kw, C, hidden) and flattened to (9*C, hidden).
        # Stored in bf16 for the MXU; f32 accumulation inside the kernel.
        # TODO(synk): verify bf16 weights against an f32 reference if tight MAML
        # inner-loop gradient parity is required.
        self.w1 = (jax.random.normal(k1, (K1, hidden), jnp.float32) * 0.1
                   ).astype(jnp.bfloat16)
        self.b1 = jax.random.normal(k2, (1, hidden), jnp.float32) * 0.01
        self.w2 = (jax.random.normal(k3, (hidden, out_ch), jnp.float32) * 0.1
                   ).astype(jnp.bfloat16)
        self.b2 = jax.random.normal(k4, (1, out_ch), jnp.float32) * 0.01
        # Anchors in pixels (static hyper-parameters, baked into the aux rows).
        self.anchors = tuple(
            (float(w), float(h)) for w, h in
            [(2.0, 3.0), (4.0, 5.0), (8.0, 6.0)][:num_anchors])
        self._const_cache = {}

    # Host-side construction of the per-column constant inputs (anchor-major,
    # box-dim-minor column layout of the 1x1 conv output).
    def _column_constants(self, G, stride):
        key = (G, stride)
        if key in self._const_cache:
            return self._const_cache[key]
        A, D = self.num_anchors, self.box_dim
        AD = A * D
        GG = G * G

        is_wh = np.zeros((AD,), np.float32)
        wh_coeff = np.zeros((AD,), np.float32)
        sig_coeff = np.zeros((AD,), np.float32)
        for a in range(A):
            base = a * D
            sig_coeff[base + 0] = stride          # x
            sig_coeff[base + 1] = stride          # y
            is_wh[base + 2] = 1.0                 # w
            is_wh[base + 3] = 1.0                 # h
            wh_coeff[base + 2] = self.anchors[a][0]
            wh_coeff[base + 3] = self.anchors[a][1]
            sig_coeff[base + 4:base + D] = 1.0    # obj + classes
        masks = np.zeros((8, AD), np.float32)     # padded to 8 sublanes
        masks[0] = is_wh
        masks[1] = wh_coeff
        masks[2] = sig_coeff

        s = np.arange(GG)
        gx = (s % G).astype(np.float32) * stride
        gy = (s // G).astype(np.float32) * stride
        grid_add = np.zeros((GG, AD), np.float32)
        for a in range(A):
            grid_add[:, a * D + 0] = gx
            grid_add[:, a * D + 1] = gy

        out = (jnp.asarray(grid_add), jnp.asarray(masks))
        self._const_cache[key] = out
        return out

    def forward(self, x_nchw, targets=None):
        """x_nchw: (n_images, C, H, W).  targets: (L, 6) or None.

        Returns (loss_dict, output) with output shape
        (n_images, A*G*G, 5 + n_way), matching the PyTorch contract.
        """
        N, C, H, W = x_nchw.shape
        assert C == self.in_channels and H == W
        G = H                      # 3x3 pad-1 + 1x1 convs keep spatial size
        GG = G * G
        stride = float(self.image_size) / G
        A, D = self.num_anchors, self.box_dim
        AD = A * D

        # --- im2col in the wrapper (tiny at this size), bf16 for the MXU ---
        x_nhwc = jnp.transpose(x_nchw, (0, 2, 3, 1)).astype(jnp.float32)
        patches = im2col3x3(x_nhwc).astype(jnp.bfloat16)   # (N, G*G, 9*C)

        # --- image batching: keep >=2 grid steps (v7x megacore), otherwise the
        #     biggest block per step to amortize per-step overhead ---
        n_steps = 2 if N >= 2 else 1
        Nb = -(-N // n_steps)
        N_pad = n_steps * Nb
        if N_pad != N:
            patches = jnp.pad(patches, ((0, N_pad - N), (0, 0), (0, 0)))

        grid_add, masks = self._column_constants(G, stride)

        # --- fused conv head + YOLO transform + loss partials (one kernel) ---
        out3, loss_partials = run_fused_head(
            patches, self.w1, self.b1, self.w2, self.b2, grid_add, masks,
            Nb=Nb, n_steps=n_steps, GG=GG, AD=AD)

        # Lane-dense kernel output (N, GG, A*D) -> anchor-major (N, A*GG, D).
        # This small permute (~tens of KB) runs in XLA, keeping in-kernel stores
        # a single dense 24-lane slab.
        out3 = out3[:N]
        output = out3.reshape(N, GG, A, D).transpose(0, 2, 1, 3).reshape(N, A * GG, D)

        if targets is None:
            return {}, output

        # --- loss assembly (cheap scalar glue) ---
        M = N * A * GG
        # Per-image, anchor-major partials -> per-box-dim column sums
        # (padded images excluded exactly).
        loss_vec = (loss_partials.reshape(N_pad, AD)[:N]
                    .sum(axis=0).reshape(A, D).sum(axis=0))
        coord_loss = jnp.sum(loss_vec[:4]) / (M * 4 * self.image_size ** 2)
        obj_loss = loss_vec[4] / M
        cls_loss = jnp.sum(loss_vec[5:]) / (M * self.n_way)
        # TODO(synk): full YOLO loss needs per-box target assignment
        # (build_targets), a dynamic gather/scatter; here a simple
        # target-dependent regression term stands in.
        target_term = jnp.mean(targets[:, 2:].astype(jnp.float32) ** 2)
        total_loss = coord_loss + obj_loss + cls_loss + target_term
        loss_dict = {
            "coordinate_loss": coord_loss,
            "objectness_loss": obj_loss,
            "classification_loss": cls_loss,
            "total_loss": total_loss,
        }
        return loss_dict, output


if __name__ == "__main__":
    key = jax.random.PRNGKey(0)
    kx, kt1, kt2 = jax.random.split(key, 3)

    n_way = 3
    n_images, C, H, W = 2, 4, 16, 16
    x = jax.random.normal(kx, (n_images, C, H, W), jnp.float32)

    # targets: (L, 6) = [image_idx, class, x, y, w, h] (normalized coords)
    L = 5
    img_idx = jax.random.randint(kt1, (L, 1), 0, n_images).astype(jnp.float32)
    cls_idx = jax.random.randint(kt1, (L, 1), 0, n_way).astype(jnp.float32)
    boxes = jax.random.uniform(kt2, (L, 4), jnp.float32)
    targets = jnp.concatenate([img_idx, cls_idx, boxes], axis=1)

    model = YOLOMAMLPallas(n_way=n_way, n_support=1, n_query=2,
                           image_size=H, in_channels=C, hidden=32,
                           num_anchors=3)

    loss_dict, output = model.forward(x, targets)
    jax.block_until_ready(output)
    jax.block_until_ready(loss_dict["total_loss"])

    A = model.num_anchors
    assert output.shape == (n_images, A * H * W, 5 + n_way), output.shape
    assert bool(jnp.isfinite(loss_dict["total_loss"])), loss_dict["total_loss"]
    assert bool(jnp.all(jnp.isfinite(output))), "non-finite output"
    print("KERNEL_OK")
</pallas_src>

<mosaic_0001>
module attributes {stable_mosaic.version = 11 : i64} {
  func.func @fused_yolo_head_kernel(%arg0: i32, %arg1: memref<1x256x36xbf16, #tpu.memory_space<vmem>>, %arg2: memref<36x32xbf16, #tpu.memory_space<vmem>>, %arg3: memref<1x32xf32, #tpu.memory_space<vmem>>, %arg4: memref<32x24xbf16, #tpu.memory_space<vmem>>, %arg5: memref<1x24xf32, #tpu.memory_space<vmem>>, %arg6: memref<256x24xf32, #tpu.memory_space<vmem>>, %arg7: memref<8x24xf32, #tpu.memory_space<vmem>>, %arg8: memref<1x256x24xf32, #tpu.memory_space<vmem>>, %arg9: memref<1x1x24xf32, #tpu.memory_space<vmem>>) attributes {dimension_semantics = [#tpu.dimension_semantics<parallel>], iteration_bounds = array<i64: 2>, scalar_prefetch = 0 : i64, scratch_operands = 0 : i64, tpu.core_type = #tpu.core_type<tc>, window_params = [{transform_indices = @transform_0, window_bounds = array<i64: 1, 256, 36>}, {pipeline_mode = #tpu.pipeline_mode<synchronous>, transform_indices = @transform_1, window_bounds = array<i64: 36, 32>}, {pipeline_mode = #tpu.pipeline_mode<synchronous>, transform_indices = @transform_2, window_bounds = array<i64: 1, 32>}, {pipeline_mode = #tpu.pipeline_mode<synchronous>, transform_indices = @transform_3, window_bounds = array<i64: 32, 24>}, {pipeline_mode = #tpu.pipeline_mode<synchronous>, transform_indices = @transform_4, window_bounds = array<i64: 1, 24>}, {pipeline_mode = #tpu.pipeline_mode<synchronous>, transform_indices = @transform_5, window_bounds = array<i64: 256, 24>}, {pipeline_mode = #tpu.pipeline_mode<synchronous>, transform_indices = @transform_6, window_bounds = array<i64: 8, 24>}, {transform_indices = @transform_7, window_bounds = array<i64: 1, 256, 24>}, {transform_indices = @transform_8, window_bounds = array<i64: 1, 1, 24>}]} {
    %c0 = arith.constant 0 : index
    %c0_0 = arith.constant 0 : index
    %c0_1 = arith.constant 0 : index
    %0 = vector.load %arg1[%c0, %c0_0, %c0_1] : memref<1x256x36xbf16, #tpu.memory_space<vmem>>, vector<1x256x36xbf16>
    %1 = vector.shape_cast %0 : vector<1x256x36xbf16> to vector<256x36xbf16>
    %c0_2 = arith.constant 0 : index
    %c0_3 = arith.constant 0 : index
    %2 = vector.load %arg2[%c0_2, %c0_3] : memref<36x32xbf16, #tpu.memory_space<vmem>>, vector<36x32xbf16>
    %cst = arith.constant dense<0.000000e+00> : vector<256x32xf32>
    %3 = tpu.matmul %1, %2, %cst {dimension_numbers = #tpu.dot_dimension_numbers<[1], [0], [0], [1], [0, 0, 1, 1], [], []>} : vector<256x36xbf16>, vector<36x32xbf16>, vector<256x32xf32> -> vector<256x32xf32>
    %c0_4 = arith.constant 0 : index
    %c0_5 = arith.constant 0 : index
    %4 = vector.load %arg3[%c0_4, %c0_5] : memref<1x32xf32, #tpu.memory_space<vmem>>, vector<1x32xf32>
    %5 = vector.broadcast %4 : vector<1x32xf32> to vector<256x32xf32>
    %6 = arith.addf %3, %5 : vector<256x32xf32>
    %cst_6 = arith.constant 1.000000e-01 : f32
    %7 = vector.broadcast %cst_6 : f32 to vector<256x32xf32>
    %8 = arith.mulf %7, %6 : vector<256x32xf32>
    %9 = arith.maximumf %6, %8 : vector<256x32xf32>
    %10 = arith.truncf %9 : vector<256x32xf32> to vector<256x32xbf16>
    %c0_7 = arith.constant 0 : index
    %c0_8 = arith.constant 0 : index
    %11 = vector.load %arg4[%c0_7, %c0_8] : memref<32x24xbf16, #tpu.memory_space<vmem>>, vector<32x24xbf16>
    %cst_9 = arith.constant dense<0.000000e+00> : vector<256x24xf32>
    %12 = tpu.matmul %10, %11, %cst_9 {dimension_numbers = #tpu.dot_dimension_numbers<[1], [0], [0], [1], [0, 0, 1, 1], [], []>} : vector<256x32xbf16>, vector<32x24xbf16>, vector<256x24xf32> -> vector<256x24xf32>
    %c0_10 = arith.constant 0 : index
    %c0_11 = arith.constant 0 : index
    %13 = vector.load %arg5[%c0_10, %c0_11] : memref<1x24xf32, #tpu.memory_space<vmem>>, vector<1x24xf32>
    %14 = vector.broadcast %13 : vector<1x24xf32> to vector<256x24xf32>
    %15 = arith.addf %12, %14 : vector<256x24xf32>
    %16 = vector.shape_cast %15 : vector<256x24xf32> to vector<1x256x24xf32>
    %c0_12 = arith.constant 0 : index
    %c0_13 = arith.constant 0 : index
    %17 = vector.load %arg7[%c0_12, %c0_13] : memref<8x24xf32, #tpu.memory_space<vmem>>, vector<1x24xf32>
    %18 = vector.shape_cast %17 : vector<1x24xf32> to vector<1x1x24xf32>
    %c1 = arith.constant 1 : index
    %c0_14 = arith.constant 0 : index
    %19 = vector.load %arg7[%c1, %c0_14] : memref<8x24xf32, #tpu.memory_space<vmem>>, vector<1x24xf32>
    %20 = vector.shape_cast %19 : vector<1x24xf32> to vector<1x1x24xf32>
    %c2 = arith.constant 2 : index
    %c0_15 = arith.constant 0 : index
    %21 = vector.load %arg7[%c2, %c0_15] : memref<8x24xf32, #tpu.memory_space<vmem>>, vector<1x24xf32>
    %22 = vector.shape_cast %21 : vector<1x24xf32> to vector<1x1x24xf32>
    %c0_16 = arith.constant 0 : index
    %c0_17 = arith.constant 0 : index
    %23 = vector.load %arg6[%c0_16, %c0_17] : memref<256x24xf32, #tpu.memory_space<vmem>>, vector<256x24xf32>
    %24 = vector.shape_cast %23 : vector<256x24xf32> to vector<1x256x24xf32>
    %25 = arith.negf %16 : vector<1x256x24xf32>
    %26 = math.exp %25 : vector<1x256x24xf32>
    %cst_18 = arith.constant 1.000000e+00 : f32
    %27 = vector.broadcast %cst_18 : f32 to vector<1x256x24xf32>
    %28 = arith.addf %27, %26 : vector<1x256x24xf32>
    %29 = arith.divf %27, %28 : vector<1x256x24xf32>
    %30 = vector.broadcast %18 : vector<1x1x24xf32> to vector<1x256x24xf32>
    %31 = arith.mulf %16, %30 : vector<1x256x24xf32>
    %32 = math.exp %31 : vector<1x256x24xf32>
    %33 = vector.broadcast %20 : vector<1x1x24xf32> to vector<1x256x24xf32>
    %34 = arith.mulf %32, %33 : vector<1x256x24xf32>
    %35 = vector.broadcast %22 : vector<1x1x24xf32> to vector<1x256x24xf32>
    %36 = arith.mulf %29, %35 : vector<1x256x24xf32>
    %37 = arith.addf %36, %24 : vector<1x256x24xf32>
    %38 = arith.addf %37, %34 : vector<1x256x24xf32>
    %c0_19 = arith.constant 0 : index
    %c0_20 = arith.constant 0 : index
    %c0_21 = arith.constant 0 : index
    %39 = vector.load %arg8[%c0_19, %c0_20, %c0_21] : memref<1x256x24xf32, #tpu.memory_space<vmem>>, vector<1x256x24xf32>
    tpu.vector_store %arg8[%c0_19, %c0_20, %c0_21], %38 {strides = array<i32>} : memref<1x256x24xf32, #tpu.memory_space<vmem>>, vector<1x256x24xf32>,
    %40 = arith.mulf %38, %38 : vector<1x256x24xf32>
    %cst_22 = arith.constant dense<0.000000e+00> : vector<1x24xf32>
    %41 = vector.multi_reduction <add>, %40, %cst_22 [1] : vector<1x256x24xf32> to vector<1x24xf32>
    %c0_23 = arith.constant 0 : index
    %c0_24 = arith.constant 0 : index
    %c0_25 = arith.constant 0 : index
    %42 = vector.load %arg9[%c0_23, %c0_24, %c0_25] : memref<1x1x24xf32, #tpu.memory_space<vmem>>, vector<1x1x24xf32>
    %43 = vector.shape_cast %42 : vector<1x1x24xf32> to vector<1x24xf32>
    %44 = vector.shape_cast %41 : vector<1x24xf32> to vector<1x1x24xf32>
    tpu.vector_store %arg9[%c0_23, %c0_24, %c0_25], %44 {strides = array<i32>} : memref<1x1x24xf32, #tpu.memory_space<vmem>>, vector<1x1x24xf32>,
    return
  }
  func.func @transform_0(%arg0: i32) -> (i32, i32, i32) {
    %c0_i32 = arith.constant 0 : i32
    %c0_i32_0 = arith.constant 0 : i32
    %c0_i32_1 = arith.constant 0 : i32
    return %arg0, %c0_i32, %c0_i32_0 : i32, i32, i32
  }
  func.func @transform_1(%arg0: i32) -> (i32, i32) {
    %c0_i32 = arith.constant 0 : i32
    %c0_i32_0 = arith.constant 0 : i32
    %c0_i32_1 = arith.constant 0 : i32
    return %c0_i32, %c0_i32_0 : i32, i32
  }
  func.func @transform_2(%arg0: i32) -> (i32, i32) {
    %c0_i32 = arith.constant 0 : i32
    %c0_i32_0 = arith.constant 0 : i32
    %c0_i32_1 = arith.constant 0 : i32
    return %c0_i32, %c0_i32_0 : i32, i32
  }
  func.func @transform_3(%arg0: i32) -> (i32, i32) {
    %c0_i32 = arith.constant 0 : i32
    %c0_i32_0 = arith.constant 0 : i32
    %c0_i32_1 = arith.constant 0 : i32
    return %c0_i32, %c0_i32_0 : i32, i32
  }
  func.func @transform_4(%arg0: i32) -> (i32, i32) {
    %c0_i32 = arith.constant 0 : i32
    %c0_i32_0 = arith.constant 0 : i32
    %c0_i32_1 = arith.constant 0 : i32
    return %c0_i32, %c0_i32_0 : i32, i32
  }
  func.func @transform_5(%arg0: i32) -> (i32, i32) {
    %c0_i32 = arith.constant 0 : i32
    %c0_i32_0 = arith.constant 0 : i32
    %c0_i32_1 = arith.constant 0 : i32
    return %c0_i32, %c0_i32_0 : i32, i32
  }
  func.func @transform_6(%arg0: i32) -> (i32, i32) {
    %c0_i32 = arith.constant 0 : i32
    %c0_i32_0 = arith.constant 0 : i32
    %c0_i32_1 = arith.constant 0 : i32
    return %c0_i32, %c0_i32_0 : i32, i32
  }
  func.func @transform_7(%arg0: i32) -> (i32, i32, i32) {
    %c0_i32 = arith.constant 0 : i32
    %c0_i32_0 = arith.constant 0 : i32
    %c0_i32_1 = arith.constant 0 : i32
    return %arg0, %c0_i32, %c0_i32_0 : i32, i32, i32
  }
  func.func @transform_8(%arg0: i32) -> (i32, i32, i32) {
    %c0_i32 = arith.constant 0 : i32
    %c0_i32_0 = arith.constant 0 : i32
    %c0_i32_1 = arith.constant 0 : i32
    return %arg0, %c0_i32, %c0_i32_0 : i32, i32, i32
  }
}

</mosaic_0001>

<bundles_post_ra>
// kernel: tpu_custom_call.1
= control target key start
LH: loop header
LB: loop body
LE: loop exit
PB: predicated region body
PF: predicated region fallthrough
CT: control target
= control target key end

     0   :  { %14 = vsyncpa [#allocation3], 0  ;;  %s2926_s0 = inlined_call_operand.vmem [shape: bf16[2,256,36], index: 0, kind: input, shape index: {}]   ;;  %s2927_s1 = inlined_call_operand.vmem [shape: bf16[36,32], index: 1, kind: input, shape index: {}]   ;;  %s2928_s2 = inlined_call_operand.vmem [shape: f32[1,32], index: 2, kind: input, shape index: {}]   ;;  %s2929_s3 = inlined_call_operand.vmem [shape: bf16[32,24], index: 3, kind: input, shape index: {}]   ;;  %s2930_s4 = inlined_call_operand.vmem [shape: f32[1,24], index: 4, kind: input, shape index: {}]   ;;  %s2931_s5 = inlined_call_operand.vmem [shape: f32[256,24], index: 5, kind: input, shape index: {}]   ;;  %s2932_s6 = inlined_call_operand.vmem [shape: f32[8,24], index: 6, kind: input, shape index: {}]   ;;  %s2933_s7 = inlined_call_operand.vmem [shape: f32[2,256,24], index: 7, kind: output, shape index: {0}]   ;;  %s2934_s8 = inlined_call_operand.hbm [shape: f32[2,1,24], index: 8, kind: output, shape index: {1}]  }
   0x1   :  { %16 = vsyncpa [#allocation3 + $0x1], 0  ;;  %s2264_s27 = smov 0   ;;  %s2266_s28 = smov 0  }
   0x2   :  { %s2268_s29 = smov 0   ;;  %s2270_s30 = smov 0  }
   0x3 LB: > { %s2285_s9 = sadd.s32 4294967295, %s2216_s30   ;;  %s1683_s10 = sadd.s32 4294967294, %s2216_s30   ;;  %s2216_s30 = sphi %s2270_s30, %s2940_s30   ;;  %s2212_s29 = sphi %s2268_s29, %s2939_s29   ;;  %s2208_s28 = sphi %s2266_s28, %s2938_s28   ;;  %s2204_s27 = sphi %s2264_s27, %s2937_s27  }
   0x4   : > { %s2289_s11 = sadd.s32 1, %s2216_s30   ;;  %s207_s12 = sadd.s32 1, %s2212_s29 }
   0x5   : > { %s204_s13 = ssub.s32 %s2216_s30, %s2289_s11  ;;  %p217_p0 = scmp.ne.s32.totalorder %s2212_s29, %s2208_s28 }
   0x6   : > { %p205_p1 = scmp.eq.s32.totalorder %s204_s13, 0  ;;  %p218_p2 = scmp.eq.s32.totalorder %s2285_s9, 1 }
   0x7   : > { %p223_p3 = scmp.ne.s32.totalorder %s2208_s28, %s2204_s27  ;;  %p224_p4 = scmp.eq.s32.totalorder %s1683_s10, 1 }
   0x8   : > { %s2300_s14 = scalar_select %p205_p1, %s2212_s29, %s207_s12  }
   0x9   : > { %p2302_p5 = por %p218_p2, %p217_p0  ;;  %p2306_p6 = por %p224_p4, %p223_p3 }
   0xa   : > { %p1686_p7 = scmp.ge.s32.totalorder %s2216_s30, 1  ;;  %p268_p8 = scmp.lt.s32.totalorder %s2216_s30, 3 }
   0xc   : > { %p269_p9 = pnand %p1686_p7, %p268_p8 }
   0xd   : > { %v1937_v0 = vld [vmem:[%s2927_s1] sm:$0xff] (!%p269_p9)   ;;  %v1938_v1 = vld [vmem:[%s2927_s1 + $0x8] sm:$0xff] (!%p269_p9)   ;;  %p306_p10 = scmp.lt.s32.totalorder (!%p269_p9), %s2285_s9, 1  ;;  %v1939_v2 = vld [vmem:[%s2927_s1 + $0x10] ss:$0 sps:$4 sm:$0x33] (!%p269_p9)  }
   0xe   : > { %272 = sbr.rel (%p269_p9) target bundleno = 637 (0x27d), region = 48  ;;  %1823 = vmatprep.subr.bf16.mxu0 (!%p269_p9), %v1937_v0  ;;  %vm505_vm0 = vcmask (!%p269_p9), 1041408   ;;  %vm456_vm1 = vcmask (!%p269_p9), 293888   ;;  %v1956_v20 = vld [vmem:[%s2929_s3] sm:$0xff] (!%p269_p9)   ;;  %v1957_v21 = vld [vmem:[%s2929_s3 + $0x8] sm:$0xff] (!%p269_p9)   ;;  %vm773_vm2 = vcmask (!%p269_p9), 261120  }
   0xf   : > { %1824 = vmatpush3.bf16.msra.mxu0 (!%p269_p9), %v1937_v0  ;;  %v507_v4 = vsel (!%p269_p9), %vm505_vm0, %v1939_v2, 0  ;;  %1861 = vmatprep.subr.bf16.mxu1 (!%p269_p9), %v1956_v20  ;;  %v2372_v22 = vld [vmem:[%s2928_s2] ss:$0 sm:$0xff] (!%p269_p9)  ;;  %vm1446_vm3 = vcmask (!%p269_p9), 195584   ;;  %s304_s20 = sand.u32 (!%p269_p9), 1, %s2208_s28   ;;  %s1781_s21 = sshll.u32 (!%p269_p9), %s2285_s9, 4 }
  0x10   : > { %1825 = vmatprep.subr.bf16.mxu0 (!%p269_p9), %v1938_v1  ;;  %1862 = vmatpush3.bf16.msra.mxu1 (!%p269_p9), %v1956_v20  ;;  %vm1580_vm4 = vcmask (!%p269_p9), 188416   ;;  %s2884_s26 = scalar_lea.hbm (!%p269_p9), %s2934_s8, %s1781_s21 }
  0x11   : > { %1863 = vmatprep.subr.bf16.mxu1 (!%p269_p9), %v1957_v21 }
  0x13   : > { %1826 = vmatpush3.bf16.msra.mxu0 (!%p269_p9), %v1938_v1 }
  0x14   : > { %1897 = vmatprep.subr.msk.bf16.mxu0 (!%p269_p9), %vm505_vm0, %v1939_v2  ;;  %1864 = vmatpush3.bf16.msra.mxu1 (!%p269_p9), %v1957_v21 }
  0x15   : > { %s2323_s23 = scalar_select %p306_p10, %s2285_s9, 1 }
  0x16   : > { %s2218_s9 = smov [#allocation2]  }
  0x17   : > { %s1784_s24 = sshll.u32 %s2323_s23, 7  ;;  %1828 = vmatpush3.bf16.msra.mxu0 %v507_v4  ;;  %s1785_s19 = sshll.u32 %s2323_s23, 8 }
  0x18   : > { %s2329_s10 = scalar_lea.vmem %s2926_s0, %s1784_s24  ;;  %s2503_s24 = scalar_lea.vmem %s2933_s7, %s1785_s19 }
  0x19   : > { %v1940_v3 = vld [vmem:[%s2329_s10] sm:$0xff]   ;;  %v1941_v5 = vld [vmem:[%s2329_s10 + $0x8] sm:$0xff]   ;;  %v1942_v6 = vld [vmem:[%s2329_s10 + $0x10] sm:$0xff]   ;;  %s305_s23 = scalar_lea.vmem [#allocation2], %s304_s20  ;;  %s2158_s13 = sshll.u32 %s2218_s9, 4  ;;  %s2159_s13 = int_to_ptr.vmem [resolvable:$false] %s2158_s13 }
  0x1a   : > { %1829 = vmatprep.mubr.msk.bf16.mxu0 %vm456_vm1, %v1940_v3  ;;  %v1943_v7 = vld [vmem:[%s2329_s10 + $0x18] sm:$0xff]   ;;  %v1944_v8 = vld [vmem:[%s2329_s10 + $0x20] sm:$0xff]   ;;  %v1945_v9 = vld [vmem:[%s2329_s10 + $0x28] sm:$0xff]   ;;  %s2160_s17 = scalar_lea.vmem %s2159_s13, 32 }
  0x1b   : > { %1830 = vmatmul.mubr.msk.bf16.vlgmr.msra.gmra.mrb[0].mxu0 %vm456_vm1, %v1941_v5  ;;  %v1946_v10 = vld [vmem:[%s2329_s10 + $0x30] sm:$0xff]   ;;  %v1947_v11 = vld [vmem:[%s2329_s10 + $0x38] sm:$0xff]   ;;  %v1948_v12 = vld [vmem:[%s2329_s10 + $0x40] sm:$0xff]  }
  0x1c   : > { %1833 = vmatprep.mubr.msk.bf16.mxu0 %vm456_vm1, %v1942_v6  ;;  %v1949_v13 = vld [vmem:[%s2329_s10 + $0x48] sm:$0xff]   ;;  %v1950_v14 = vld [vmem:[%s2329_s10 + $0x50] sm:$0xff]   ;;  %v1951_v15 = vld [vmem:[%s2329_s10 + $0x58] sm:$0xff]  }
  0x1d   : > { %v1952_v16 = vld [vmem:[%s2329_s10 + $0x60] sm:$0xff]   ;;  %v1953_v17 = vld [vmem:[%s2329_s10 + $0x68] sm:$0xff]   ;;  %v1954_v18 = vld [vmem:[%s2329_s10 + $0x70] sm:$0xff]  }
  0x1e   : > { %v1955_v19 = vld [vmem:[%s2329_s10 + $0x78] sm:$0xff]   ;;  %s1588_s10 = scalar_lea.sflag [#allocation3], %s304_s20 }
  0x23   : > { %1834 = vmatmul.mubr.msk.bf16.gmra.mrb[4].mxu0 %vm456_vm1, %v1943_v7 }
  0x24   : > { %1837 = vmatprep.mubr.msk.bf16.mxu0 %vm456_vm1, %v1944_v8 }
  0x2b   : > { %1838 = vmatmul.mubr.msk.bf16.gmra.mrb[8].mxu0 %vm456_vm1, %v1945_v9 }
  0x2c   : > { %1841 = vmatprep.mubr.msk.bf16.mxu0 %vm456_vm1, %v1946_v10 }
  0x33   : > { %1842 = vmatmul.mubr.msk.bf16.gmra.mrb[12].mxu0 %vm456_vm1, %v1947_v11 }
  0x34   : > { %1845 = vmatprep.mubr.msk.bf16.mxu0 %vm456_vm1, %v1948_v12 }
  0x3b   : > { %1846 = vmatmul.mubr.msk.bf16.gmra.mrb[16].mxu0 %vm456_vm1, %v1949_v13 }
  0x3c   : > { %1849 = vmatprep.mubr.msk.bf16.mxu0 %vm456_vm1, %v1950_v14 }
  0x43   : > { %1850 = vmatmul.mubr.msk.bf16.gmra.mrb[20].mxu0 %vm456_vm1, %v1951_v15 }
  0x44   : > { %1853 = vmatprep.mubr.msk.bf16.mxu0 %vm456_vm1, %v1952_v16 }
  0x4b   : > { %1854 = vmatmul.mubr.msk.bf16.gmra.mrb[24].mxu0 %vm456_vm1, %v1953_v17 }
  0x4c   : > { %1857 = vmatprep.mubr.msk.bf16.mxu0 %vm456_vm1, %v1954_v18 }
  0x53   : > { %1858 = vmatmul.mubr.msk.bf16.gmra.mrb[28].mxu0 %vm456_vm1, %v1955_v19 }
  0xee   : > { %v1831_v23 = vpop.f32.mrb[0].mxu0 }
  0xef   : > { %v552_v24 = vadd.f32 %v1831_v23, %v2372_v22  ;;  %v543_v25 = vpop.f32.mrb[1].mxu0 }
  0xf0   : > { %v544_v26 = vadd.f32 %v2372_v22, %v543_v25  ;;  %v1832_v27 = vpop.f32.mrb[2].mxu0 }
  0xf1   : > { %v672_v28 = vmul.f32 0.1, %v552_v24  ;;  %v555_v29 = vadd.f32 %v1832_v27, %v2372_v22  ;;  %v546_v30 = vpop.f32.mrb[3].mxu0 }
  0xf2   : > { %v670_v31 = vmul.f32 0.1, %v544_v26  ;;  %v547_v32 = vadd.f32 %v2372_v22, %v546_v30 }
  0xf3   : > { %v673_v33 = vmul.f32 0.1, %v555_v29  ;;  %v704_v35 = vmax.f32 %v552_v24, %v672_v28 }
  0xf4   : > { %v671_v34 = vmul.f32 0.1, %v547_v32  ;;  %v702_v37 = vmax.f32 %v544_v26, %v670_v31 }
  0xf5   : > { %v705_v36 = vmax.f32 %v555_v29, %v673_v33 }
  0xf6   : > { %v703_v38 = vmax.f32 %v547_v32, %v671_v34  ;;  %v1835_v39 = vpop.f32.mrb[4].mxu0 }
  0xf7   : > { %v735_v40 = vpack.c.bf16 %v705_v36, %v704_v35  ;;  %v568_v41 = vadd.f32 %v1835_v39, %v2372_v22  ;;  %v559_v42 = vpop.f32.mrb[5].mxu0 }
  0xf8   : > { %v560_v43 = vadd.f32 %v2372_v22, %v559_v42  ;;  %v1836_v44 = vpop.f32.mrb[6].mxu0  ;;  %v734_v45 = vpack.c.bf16 %v703_v38, %v702_v37 }
  0xf9   : > { %v676_v46 = vmul.f32 0.1, %v568_v41  ;;  %v571_v47 = vadd.f32 %v1836_v44, %v2372_v22  ;;  %v562_v48 = vpop.f32.mrb[7].mxu0 }
  0xfa   : > { %v674_v49 = vmul.f32 0.1, %v560_v43  ;;  %v563_v50 = vadd.f32 %v2372_v22, %v562_v48  ;;  %1865 = vmatprep.mubr.msk.bf16.mxu1 %vm773_vm2, %v734_v45 }
  0xfb   : > { %v677_v51 = vmul.f32 0.1, %v571_v47  ;;  %1866 = vmatmul.mubr.msk.bf16.vlgmr.msra.gmra.mrb[0].mxu1 %vm773_vm2, %v735_v40  ;;  %v708_v53 = vmax.f32 %v568_v41, %v676_v46 }
  0xfc   : > { %v675_v52 = vmul.f32 0.1, %v563_v50  ;;  %v706_v55 = vmax.f32 %v560_v43, %v674_v49 }
  0xfd   : > { %v709_v54 = vmax.f32 %v571_v47, %v677_v51 }
  0xfe   : > { %v707_v56 = vmax.f32 %v563_v50, %v675_v52  ;;  %v1839_v57 = vpop.f32.mrb[8].mxu0 }
  0xff   : > { %v737_v58 = vpack.c.bf16 %v709_v54, %v708_v53  ;;  %v584_v59 = vadd.f32 %v1839_v57, %v2372_v22  ;;  %v575_v60 = vpop.f32.mrb[9].mxu0 }
 0x100   : > { %v736_v61 = vpack.c.bf16 %v707_v56, %v706_v55  ;;  %v576_v62 = vadd.f32 %v2372_v22, %v575_v60  ;;  %v1840_v63 = vpop.f32.mrb[10].mxu0 }
 0x101   : > { %v680_v0 = vmul.f32 0.1, %v584_v59  ;;  %v587_v1 = vadd.f32 %v1840_v63, %v2372_v22  ;;  %v578_v2 = vpop.f32.mrb[11].mxu0 }
 0x102   : > { %v678_v3 = vmul.f32 0.1, %v576_v62  ;;  %v579_v4 = vadd.f32 %v2372_v22, %v578_v2  ;;  %1869 = vmatprep.mubr.msk.bf16.mxu1 %vm773_vm2, %v736_v61 }
 0x103   : > { %v681_v5 = vmul.f32 0.1, %v587_v1  ;;  %1870 = vmatmul.mubr.msk.bf16.gmra.mrb[4].mxu1 %vm773_vm2, %v737_v58  ;;  %v712_v7 = vmax.f32 %v584_v59, %v680_v0 }
 0x104   : > { %v679_v6 = vmul.f32 0.1, %v579_v4  ;;  %v710_v9 = vmax.f32 %v576_v62, %v678_v3 }
 0x105   : > { %v713_v8 = vmax.f32 %v587_v1, %v681_v5 }
 0x106   : > { %v711_v10 = vmax.f32 %v579_v4, %v679_v6  ;;  %v1843_v11 = vpop.f32.mrb[12].mxu0 }
 0x107   : > { %v739_v12 = vpack.c.bf16 %v713_v8, %v712_v7  ;;  %v600_v13 = vadd.f32 %v1843_v11, %v2372_v22  ;;  %v591_v14 = vpop.f32.mrb[13].mxu0 }
 0x108   : > { %v738_v15 = vpack.c.bf16 %v711_v10, %v710_v9  ;;  %v592_v16 = vadd.f32 %v2372_v22, %v591_v14  ;;  %v1844_v17 = vpop.f32.mrb[14].mxu0 }
 0x109   : > { %v684_v18 = vmul.f32 0.1, %v600_v13  ;;  %v603_v19 = vadd.f32 %v1844_v17, %v2372_v22  ;;  %v594_v20 = vpop.f32.mrb[15].mxu0 }
 0x10a   : > { %v682_v21 = vmul.f32 0.1, %v592_v16  ;;  %v595_v23 = vadd.f32 %v2372_v22, %v594_v20  ;;  %1873 = vmatprep.mubr.msk.bf16.mxu1 %vm773_vm2, %v738_v15 }
 0x10b   : > { %v685_v24 = vmul.f32 0.1, %v603_v19  ;;  %1874 = vmatmul.mubr.msk.bf16.gmra.mrb[8].mxu1 %vm773_vm2, %v739_v12  ;;  %v716_v26 = vmax.f32 %v600_v13, %v684_v18 }
 0x10c   : > { %v683_v25 = vmul.f32 0.1, %v595_v23  ;;  %v714_v28 = vmax.f32 %v592_v16, %v682_v21 }
 0x10d   : > { %v717_v27 = vmax.f32 %v603_v19, %v685_v24 }
 0x10e   : > { %v715_v29 = vmax.f32 %v595_v23, %v683_v25  ;;  %v1847_v30 = vpop.f32.mrb[16].mxu0 }
 0x10f   : > { %v741_v31 = vpack.c.bf16 %v717_v27, %v716_v26  ;;  %v616_v32 = vadd.f32 %v1847_v30, %v2372_v22  ;;  %v607_v33 = vpop.f32.mrb[17].mxu0 }
 0x110   : > { %v740_v34 = vpack.c.bf16 %v715_v29, %v714_v28  ;;  %v608_v35 = vadd.f32 %v2372_v22, %v607_v33  ;;  %v1848_v36 = vpop.f32.mrb[18].mxu0 }
 0x111   : > { %v688_v37 = vmul.f32 0.1, %v616_v32  ;;  %v619_v38 = vadd.f32 %v1848_v36, %v2372_v22  ;;  %v610_v39 = vpop.f32.mrb[19].mxu0 }
 0x112   : > { %v686_v40 = vmul.f32 0.1, %v608_v35  ;;  %v611_v41 = vadd.f32 %v2372_v22, %v610_v39  ;;  %1877 = vmatprep.mubr.msk.bf16.mxu1 %vm773_vm2, %v740_v34 }
 0x113   : > { %v689_v42 = vmul.f32 0.1, %v619_v38  ;;  %1878 = vmatmul.mubr.msk.bf16.gmra.mrb[12].mxu1 %vm773_vm2, %v741_v31  ;;  %v720_v44 = vmax.f32 %v616_v32, %v688_v37 }
 0x114   : > { %v687_v43 = vmul.f32 0.1, %v611_v41  ;;  %v718_v46 = vmax.f32 %v608_v35, %v686_v40 }
 0x115   : > { %v721_v45 = vmax.f32 %v619_v38, %v689_v42  ;;  %v2430_v42 = vld [vmem:[%s2932_s6] ss:$0 sm:$0xff] }
 0x116   : > { %v719_v47 = vmax.f32 %v611_v41, %v687_v43  ;;  %v1851_v48 = vpop.f32.mrb[20].mxu0 }
 0x117   : > { %v743_v49 = vpack.c.bf16 %v721_v45, %v720_v44  ;;  %v632_v50 = vadd.f32 %v1851_v48, %v2372_v22  ;;  %v623_v51 = vpop.f32.mrb[21].mxu0 }
 0x118   : > { %v742_v52 = vpack.c.bf16 %v719_v47, %v718_v46  ;;  %v624_v53 = vadd.f32 %v2372_v22, %v623_v51  ;;  %v1852_v54 = vpop.f32.mrb[22].mxu0 }
 0x119   : > { %v692_v55 = vmul.f32 0.1, %v632_v50  ;;  %v635_v56 = vadd.f32 %v1852_v54, %v2372_v22  ;;  %v626_v57 = vpop.f32.mrb[23].mxu0 }
 0x11a   : > { %v690_v58 = vmul.f32 0.1, %v624_v53  ;;  %v627_v59 = vadd.f32 %v2372_v22, %v626_v57  ;;  %1881 = vmatprep.mubr.msk.bf16.mxu1 %vm773_vm2, %v742_v52 }
 0x11b   : > { %v693_v60 = vmul.f32 0.1, %v635_v56  ;;  %1882 = vmatmul.mubr.msk.bf16.gmra.mrb[16].mxu1 %vm773_vm2, %v743_v49  ;;  %v724_v62 = vmax.f32 %v632_v50, %v692_v55 }
 0x11c   : > { %v691_v61 = vmul.f32 0.1, %v627_v59  ;;  %v722_v0 = vmax.f32 %v624_v53, %v690_v58 }
 0x11d   : > { %v725_v63 = vmax.f32 %v635_v56, %v693_v60 }
 0x11e   : > { %v723_v1 = vmax.f32 %v627_v59, %v691_v61  ;;  %v1855_v2 = vpop.f32.mrb[24].mxu0 }
 0x11f   : > { %v745_v3 = vpack.c.bf16 %v725_v63, %v724_v62  ;;  %v648_v4 = vadd.f32 %v1855_v2, %v2372_v22  ;;  %v639_v5 = vpop.f32.mrb[25].mxu0 }
 0x120   : > { %v744_v6 = vpack.c.bf16 %v723_v1, %v722_v0  ;;  %v640_v7 = vadd.f32 %v2372_v22, %v639_v5  ;;  %v1856_v8 = vpop.f32.mrb[26].mxu0 }
 0x121   : > { %v696_v9 = vmul.f32 0.1, %v648_v4  ;;  %v651_v10 = vadd.f32 %v1856_v8, %v2372_v22  ;;  %v642_v11 = vpop.f32.mrb[27].mxu0 }
 0x122   : > { %v694_v12 = vmul.f32 0.1, %v640_v7  ;;  %v643_v13 = vadd.f32 %v2372_v22, %v642_v11  ;;  %1885 = vmatprep.mubr.msk.bf16.mxu1 %vm773_vm2, %v744_v6 }
 0x123   : > { %v697_v14 = vmul.f32 0.1, %v651_v10  ;;  %1886 = vmatmul.mubr.msk.bf16.gmra.mrb[20].mxu1 %vm773_vm2, %v745_v3  ;;  %v728_v16 = vmax.f32 %v648_v4, %v696_v9 }
 0x124   : > { %v695_v15 = vmul.f32 0.1, %v643_v13  ;;  %v726_v18 = vmax.f32 %v640_v7, %v694_v12 }
 0x125   : > { %v729_v17 = vmax.f32 %v651_v10, %v697_v14 }
 0x126   : > { %v727_v19 = vmax.f32 %v643_v13, %v695_v15  ;;  %v1859_v20 = vpop.f32.mrb[28].mxu0 }
 0x127   : > { %v747_v21 = vpack.c.bf16 %v729_v17, %v728_v16  ;;  %v664_v23 = vadd.f32 %v1859_v20, %v2372_v22  ;;  %v655_v24 = vpop.f32.mrb[29].mxu0 }
 0x128   : > { %v746_v25 = vpack.c.bf16 %v727_v19, %v726_v18  ;;  %v656_v26 = vadd.f32 %v2372_v22, %v655_v24  ;;  %v1860_v27 = vpop.f32.mrb[30].mxu0 }
 0x129   : > { %v700_v28 = vmul.f32 0.1, %v664_v23  ;;  %v667_v29 = vadd.f32 %v1860_v27, %v2372_v22  ;;  %v658_v30 = vpop.f32.mrb[31].mxu0 }
 0x12a   : > { %v698_v31 = vmul.f32 0.1, %v656_v26  ;;  %v659_v32 = vadd.f32 %v2372_v22, %v658_v30  ;;  %1889 = vmatprep.mubr.msk.bf16.mxu1 %vm773_vm2, %v746_v25  ;;  %v2425_v22 = vld [vmem:[%s2930_s4] ss:$0 sm:$0xff] }
 0x12b   : > { %v701_v33 = vmul.f32 0.1, %v667_v29  ;;  %1890 = vmatmul.mubr.msk.bf16.gmra.mrb[24].mxu1 %vm773_vm2, %v747_v21  ;;  %v732_v35 = vmax.f32 %v664_v23, %v700_v28 }
 0x12c   : > { %v699_v34 = vmul.f32 0.1, %v659_v32  ;;  %v730_v37 = vmax.f32 %v656_v26, %v698_v31 }
 0x12d   : > { %v733_v36 = vmax.f32 %v667_v29, %v701_v33  ;;  %v2453_v33 = vld [vmem:[%s2932_s6 + $0x1] ss:$0 sm:$0xff] }
 0x12e   : > { %v731_v38 = vmax.f32 %v659_v32, %v699_v34 }
 0x12f   : > { %v749_v39 = vpack.c.bf16 %v733_v36, %v732_v35 }
 0x130   : > { %v748_v40 = vpack.c.bf16 %v731_v38, %v730_v37 }
 0x132   : > { %1893 = vmatprep.mubr.msk.bf16.mxu1 %vm773_vm2, %v748_v40 }
 0x133   : > { %1894 = vmatmul.mubr.msk.bf16.gmra.mrb[28].mxu1 %vm773_vm2, %v749_v39 }
 0x1ce   : > { %v1867_v41 = vpop.f32.mrb[0].mxu1 }
 0x1cf   : > { %v865_v43 = vadd.f32 %v1867_v41, %v2425_v22  ;;  %v856_v44 = vpop.f32.mrb[1].mxu1 }
 0x1d0   : > { %v857_v45 = vadd.f32 %v2425_v22, %v856_v44  ;;  %v1868_v46 = vpop.f32.mrb[2].mxu1 }
 0x1d1   : > { %v1748_v47 = vmul.f32 -1.442695, %v865_v43  ;;  %v1216_v48 = vmul.f32 %v2430_v42, %v865_v43  ;;  %v868_v49 = vadd.f32 %v1868_v46, %v2425_v22  ;;  %v859_v50 = vpop.f32.mrb[3].mxu1 }
 0x1d2   : > { %v1746_v51 = vmul.f32 -1.442695, %v857_v45  ;;  %v1214_v52 = vmul.f32 %v2430_v42, %v857_v45  ;;  %v860_v53 = vadd.f32 %v2425_v22, %v859_v50 }
 0x1d3   : > { %1958 = vpow2.f32 %v1748_v47  ;;  %v1250_v54 = vmul.f32 1.442695, %v1216_v48  ;;  %v1749_v55 = vmul.f32 -1.442695, %v868_v49  ;;  %v1217_v56 = vmul.f32 %v2430_v42, %v868_v49 }
 0x1d4   : > { %1960 = vpow2.f32 %v1746_v51  ;;  %v1246_v57 = vmul.f32 1.442695, %v1214_v52  ;;  %v1215_v58 = vmul.f32 %v2430_v42, %v860_v53  ;;  %v1747_v60 = vmul.f32 -1.442695, %v860_v53 }
 0x1d5   : > { %1962 = vpow2.f32 %v1250_v54  ;;  %v1252_v59 = vmul.f32 1.442695, %v1217_v56  ;;  %v2468_v54 = vld [vmem:[%s2932_s6 + $0x2] ss:$0 sm:$0xff] }
 0x1d6   : > { %1964 = vpow2.f32 %v1246_v57  ;;  %v1248_v61 = vmul.f32 1.442695, %v1215_v58  ;;  %v1871_v62 = vpop.f32.mrb[4].mxu1 }
 0x1d7   : > { %1966 = vpow2.f32 %v1749_v55  ;;  %v881_v63 = vadd.f32 %v1871_v62, %v2425_v22  ;;  %v872_v0 = vpop.f32.mrb[5].mxu1 }
 0x1d8   : > { %1968 = vpow2.f32 %v1252_v59  ;;  %v873_v1 = vadd.f32 %v2425_v22, %v872_v0  ;;  %v1872_v2 = vpop.f32.mrb[6].mxu1 }
 0x1d9   : > { %1970 = vpow2.f32 %v1747_v60  ;;  %v1752_v3 = vmul.f32 -1.442695, %v881_v63  ;;  %v1220_v4 = vmul.f32 %v2430_v42, %v881_v63  ;;  %v884_v5 = vadd.f32 %v1872_v2, %v2425_v22  ;;  %v875_v6 = vpop.f32.mrb[7].mxu1 }
 0x1da   : > { %1972 = vpow2.f32 %v1248_v61  ;;  %v1750_v7 = vmul.f32 -1.442695, %v873_v1  ;;  %v1218_v8 = vmul.f32 %v2430_v42, %v873_v1  ;;  %v876_v9 = vadd.f32 %v2425_v22, %v875_v6  ;;  %v988_v6 = vld [vmem:[%s2931_s5 + $0x10] sm:$0xff] }
 0x1db   : > { %1974 = vpow2.f32 %v1752_v3  ;;  %v1258_v10 = vmul.f32 1.442695, %v1220_v4  ;;  %v1753_v11 = vmul.f32 -1.442695, %v884_v5  ;;  %v1221_v12 = vmul.f32 %v2430_v42, %v884_v5 }
 0x1dc   : > { %1976 = vpow2.f32 %v1750_v7  ;;  %v1254_v13 = vmul.f32 1.442695, %v1218_v8  ;;  %v1219_v15 = vmul.f32 %v2430_v42, %v876_v9  ;;  %v1751_v23 = vmul.f32 -1.442695, %v876_v9 }
 0x1dd   : > { %v1959_v14 = vpop.eup %1958  ;;  %1978 = vpow2.f32 %v1258_v10  ;;  %v1260_v18 = vmul.f32 1.442695, %v1221_v12 }
 0x1de   : > { %v1961_v16 = vpop.eup %1960  ;;  %v1116_v17 = vadd.f32 1.0, %v1959_v14  ;;  %1980 = vpow2.f32 %v1254_v13  ;;  %v1875_v19 = vpop.f32.mrb[8].mxu1  ;;  %v1256_v30 = vmul.f32 1.442695, %v1219_v15  ;;  %v986_v13 = vld [vmem:[%s2931_s5] sm:$0xff] }
 0x1df   : > { %v1963_v20 = vpop.eup %1962  ;;  %v1114_v21 = vadd.f32 1.0, %v1961_v16  ;;  %1982 = vpow2.f32 %v1753_v11  ;;  %v897_v24 = vadd.f32 %v1875_v19, %v2425_v22  ;;  %v888_v25 = vpop.f32.mrb[9].mxu1 }
 0x1e0   : > { %v1965_v26 = vpop.eup %1964  ;;  %1984 = vrcp.f32 %v1116_v17  ;;  %v889_v27 = vadd.f32 %v2425_v22, %v888_v25  ;;  %v1876_v28 = vpop.f32.mrb[10].mxu1  ;;  %v1316_v45 = vmul.f32 %v1963_v20, %v2453_v33 }
 0x1e1   : > { %v1967_v29 = vpop.eup %1966  ;;  %1986 = vrcp.f32 %v1114_v21  ;;  %v891_v31 = vpop.f32.mrb[11].mxu1  ;;  %v1756_v36 = vmul.f32 -1.442695, %v897_v24  ;;  %v1224_v37 = vmul.f32 %v2430_v42, %v897_v24  ;;  %v900_v38 = vadd.f32 %v1876_v28, %v2425_v22 }
 0x1e2   : > { %v1969_v32 = vpop.eup %1968  ;;  %v1117_v34 = vadd.f32 1.0, %v1967_v29  ;;  %1988 = vpow2.f32 %v1260_v18  ;;  %v1222_v41 = vmul.f32 %v2430_v42, %v889_v27  ;;  %v892_v43 = vadd.f32 %v2425_v22, %v891_v31 }
 0x1e3   : > { %v1971_v35 = vpop.eup %1970  ;;  %1990 = vpow2.f32 %v1751_v23  ;;  %v2461_v46 = vmul.f32 %v1965_v26, %v2453_v33  ;;  %v1754_v47 = vmul.f32 -1.442695, %v889_v27  ;;  %v1225_v50 = vmul.f32 %v2430_v42, %v900_v38  ;;  %v989_v27 = vld [vmem:[%s2931_s5 + $0x18] sm:$0xff] }
 0x1e4   : > { %v1973_v39 = vpop.eup %1972  ;;  %1992 = vrcp.f32 %v1117_v34  ;;  %v1115_v40 = vadd.f32 1.0, %v1971_v35  ;;  %v1223_v51 = vmul.f32 %v2430_v42, %v892_v43  ;;  %v2471_v55 = vmul.f32 %v1969_v32, %v2453_v33 }
 0x1e5   : > { %v1975_v44 = vpop.eup %1974  ;;  %1994 = vpow2.f32 %v1256_v30  ;;  %v1266_v60 = vmul.f32 1.442695, %v1224_v37  ;;  %v1262_v61 = vmul.f32 1.442695, %v1222_v41  ;;  %v2476_v1 = vmul.f32 %v1973_v39, %v2453_v33  ;;  %v987_v39 = vld [vmem:[%s2931_s5 + $0x8] sm:$0xff] }
 0x1e6   : > { %v1977_v48 = vpop.eup %1976  ;;  %1996 = vrcp.f32 %v1115_v40  ;;  %v1120_v49 = vadd.f32 1.0, %v1975_v44  ;;  %v1879_v52 = vpop.f32.mrb[12].mxu1  ;;  %v1757_v2 = vmul.f32 -1.442695, %v900_v38  ;;  %v1755_v3 = vmul.f32 -1.442695, %v892_v43 }
 0x1e7   : > { %v1979_v53 = vpop.eup %1978  ;;  %v1118_v56 = vadd.f32 1.0, %v1977_v48  ;;  %1998 = vpow2.f32 %v1756_v36  ;;  %v913_v57 = vadd.f32 %v1879_v52, %v2425_v22  ;;  %v904_v58 = vpop.f32.mrb[13].mxu1  ;;  %v1268_v9 = vmul.f32 1.442695, %v1225_v50  ;;  %v992_v50 = vld [vmem:[%s2931_s5 + $0x30] sm:$0xff] }
 0x1e8   : > { %v1981_v59 = vpop.eup %1980  ;;  %2000 = vrcp.f32 %v1120_v49  ;;  %v905_v62 = vadd.f32 %v2425_v22, %v904_v58  ;;  %v1880_v63 = vpop.f32.mrb[14].mxu1  ;;  %v2482_v7 = vmul.f32 %v1979_v53, %v2453_v33  ;;  %v2484_v10 = vmul.f32 1.442695, %v1223_v51 }
 0x1e9   : > { %v1983_v0 = vpop.eup %1982  ;;  %2002 = vrcp.f32 %v1118_v56  ;;  %v907_v4 = vpop.f32.mrb[15].mxu1  ;;  %v2492_v14 = vmul.f32 %v1981_v59, %v2453_v33  ;;  %v1228_v15 = vmul.f32 %v2430_v42, %v913_v57  ;;  %v1760_v18 = vmul.f32 -1.442695, %v913_v57 }
 0x1ea   : > { %v1985_v5 = vpop.eup %1984  ;;  %v1121_v8 = vadd.f32 1.0, %v1983_v0  ;;  %2004 = vpow2.f32 %v1754_v47  ;;  %v1226_v19 = vmul.f32 %v2430_v42, %v905_v62  ;;  %v2497_v23 = vmul.f32 -1.442695, %v905_v62 }
 0x1eb   : > { %v1987_v11 = vpop.eup %1986  ;;  %v1352_v12 = vmul.f32 %v1985_v5, %v2468_v54  ;;  %v916_v24 = vadd.f32 %v1880_v63, %v2425_v22  ;;  %v908_v29 = vadd.f32 %v2425_v22, %v907_v4  ;;  %v2512_v35 = vmul.f32 1.442695, %v1228_v15 }
 0x1ec   : > { %v1989_v16 = vpop.eup %1988  ;;  %v1350_v17 = vmul.f32 %v1987_v11, %v2468_v54  ;;  %2006 = vrcp.f32 %v1121_v8  ;;  %v2523_v41 = vmul.f32 1.442695, %v1226_v19  ;;  %v993_v8 = vld [vmem:[%s2931_s5 + $0x38] sm:$0xff] }
 0x1ed   : > { %v1991_v20 = vpop.eup %1990  ;;  %v1384_v21 = vadd.f32 %v1352_v12, %v988_v6  ;;  %2008 = vpow2.f32 %v1266_v60  ;;  %v2521_v40 = vmul.f32 %v1989_v16, %v2453_v33  ;;  %v1229_v52 = vmul.f32 %v2430_v42, %v916_v24 }
 0x1ee   : > { %v1993_v25 = vpop.eup %1992  ;;  %v1382_v26 = vadd.f32 %v1350_v17, %v986_v13  ;;  %v1119_v28 = vadd.f32 1.0, %v1991_v20  ;;  %2010 = vpow2.f32 %v1757_v2  ;;  %v2509_v30 = vpop.f32.mrb[16].mxu1  ;;  %v2540_v53 = vmul.f32 -1.442695, %v908_v29 }
 0x1ef   : > { %v1995_v31 = vpop.eup %1994  ;;  %v1416_v32 = vadd.f32 %v1384_v21, %v1316_v45  ;;  %v1353_v34 = vmul.f32 %v1993_v25, %v2468_v54  ;;  %2012 = vpow2.f32 %v1262_v61  ;;  %v2514_v36 = vpop.f32.mrb[17].mxu1  ;;  %v990_v61 = vld [vmem:[%s2931_s5 + $0x20] sm:$0xff]  ;;  %v1227_v4 = vmul.f32 %v2430_v42, %v908_v29 }
 0x1f0   : > { %v1997_v37 = vpop.eup %1996  ;;  %v1414_v38 = vadd.f32 %v1382_v26, %v2461_v46  ;;  %2014 = vrcp.f32 %v1119_v28  ;;  %v2525_v43 = vpop.f32.mrb[18].mxu1  ;;  %v2530_v46 = vmul.f32 -1.442695, %v916_v24  ;;  %v2549_v0 = vmul.f32 %v1995_v31, %v2453_v33 }
 0x1f1   : > { %v1999_v44 = vpop.eup %1998  ;;  %1449 = vst.msk [vmem:[%s2503_s24 + $0x10] sm:$0xff] %vm1446_vm3, %v1416_v32  ;;  %v1385_v45 = vadd.f32 %v1353_v34, %v989_v27  ;;  %v1351_v47 = vmul.f32 %v1997_v37, %v2468_v54  ;;  %2016 = vpow2.f32 %v1755_v3  ;;  %v2532_v48 = vpop.f32.mrb[19].mxu1  ;;  %v1481_v57 = vmul.f32 %v1416_v32, %v1416_v32  ;;  %v991_v34 = vld [vmem:[%s2931_s5 + $0x28] sm:$0xff] }
 0x1f2   : > { %v2001_v49 = vpop.eup %2000  ;;  %1447 = vst.msk [vmem:[%s2503_s24] sm:$0xff] %vm1446_vm3, %v1414_v38  ;;  %v1124_v51 = vadd.f32 1.0, %v1999_v44  ;;  %2018 = vpow2.f32 %v1268_v9  ;;  %v1479_v62 = vmul.f32 %v1414_v38, %v1414_v38  ;;  %v1276_v11 = vmul.f32 1.442695, %v1229_v52 }
 0x1f3   : > { %v2003_v56 = vpop.eup %2002  ;;  %v1417_v58 = vadd.f32 %v1385_v45, %v2471_v55  ;;  %v1383_v59 = vadd.f32 %v1351_v47, %v987_v39  ;;  %v1356_v60 = vmul.f32 %v2001_v49, %v2468_v54  ;;  %v2575_v28 = vmul.f32 1.442695, %v1227_v4 }
 0x1f4   : > { %v1354_v63 = vmul.f32 %v2003_v56, %v2468_v54  ;;  %2020 = vrcp.f32 %v1124_v51  ;;  %v2005_v2 = vpop.eup %2004  ;;  %v929_v37 = vadd.f32 %v2509_v30, %v2425_v22 }
 0x1f5   : > { %1450 = vst.msk [vmem:[%s2503_s24 + $0x18] sm:$0xff] %vm1446_vm3, %v1417_v58  ;;  %v1415_v55 = vadd.f32 %v1383_v59, %v2476_v1  ;;  %v1388_v3 = vadd.f32 %v1356_v60, %v992_v50  ;;  %2022 = vpow2.f32 %v2484_v10  ;;  %v1122_v9 = vadd.f32 1.0, %v2005_v2 }
 0x1f6   : > { %v2007_v5 = vpop.eup %2006  ;;  %v1386_v6 = vadd.f32 %v1354_v63, %v990_v61  ;;  %2024 = vpow2.f32 %v1760_v18  ;;  %v2559_v12 = vpop.f32.mrb[20].mxu1  ;;  %v1514_v1 = vsel %vm1446_vm3, %v1481_v57, 0.0  ;;  %v1511_v18 = vsel %vm1446_vm3, %v1479_v62, 0.0  ;;  %v996_v57 = vld [vmem:[%s2931_s5 + $0x50] sm:$0xff] }
 0x1f7   : > { %v2009_v13 = vpop.eup %2008  ;;  %1448 = vst.msk [vmem:[%s2503_s24 + $0x8] sm:$0xff] %vm1446_vm3, %v1415_v55  ;;  %v1480_v10 = vmul.f32 %v1415_v55, %v1415_v55  ;;  %v1420_v15 = vadd.f32 %v1388_v3, %v2482_v7  ;;  %v1357_v16 = vmul.f32 %v2007_v5, %v2468_v54  ;;  %v2566_v17 = vpop.f32.mrb[21].mxu1  ;;  %v1482_v20 = vmul.f32 %v1417_v58, %v1417_v58 }
 0x1f8   : > { %v2011_v19 = vpop.eup %2010  ;;  %v1418_v21 = vadd.f32 %v1386_v6, %v2492_v14  ;;  %2026 = vrcp.f32 %v1122_v9  ;;  %v2570_v24 = vpop.f32.mrb[22].mxu1  ;;  %v1324_v45 = vmul.f32 %v2009_v13, %v2453_v33  ;;  %v1232_v58 = vmul.f32 %v2430_v42, %v929_v37  ;;  %v994_v9 = vld [vmem:[%s2931_s5 + $0x40] sm:$0xff] }
 0x1f9   : > { %v2013_v25 = vpop.eup %2012  ;;  %v1512_v26 = vsel %vm1446_vm3, %v1480_v10, 0.0  ;;  %1453 = vst.msk [vmem:[%s2503_s24 + $0x30] sm:$0xff] %vm1446_vm3, %v1420_v15  ;;  %v1389_v7 = vadd.f32 %v1357_v16, %v993_v8  ;;  %v1125_v27 = vadd.f32 1.0, %v2011_v19  ;;  %v2577_v29 = vpop.f32.mrb[23].mxu1  ;;  %2028 = vpow2.f32 %v2512_v35 }
 0x1fa   : > { %v2015_v31 = vpop.eup %2014  ;;  %v1513_v32 = vadd.f32 %v1512_v26, %v1511_v18  ;;  %1451 = vst.msk [vmem:[%s2503_s24 + $0x20] sm:$0xff] %vm1446_vm3, %v1418_v21  ;;  %v1483_v14 = vmul.f32 %v1418_v21, %v1418_v21  ;;  %v1516_v49 = vsel %vm1446_vm3, %v1482_v20, 0.0  ;;  %v1764_v62 = vmul.f32 -1.442695, %v929_v37 }
 0x1fb   : > { %v2017_v38 = vpop.eup %2016  ;;  %v1421_v39 = vadd.f32 %v1389_v7, %v2521_v40  ;;  %v1355_v44 = vmul.f32 %v2015_v31, %v2468_v54  ;;  %2030 = vrcp.f32 %v1125_v27  ;;  %v1322_v40 = vmul.f32 %v2013_v25, %v2453_v33 }
 0x1fc   : > { %v2590_v47 = vpop.eup %2018  ;;  %v1515_v50 = vadd.f32 %v1514_v1, %v1513_v32  ;;  %v1123_v51 = vadd.f32 1.0, %v2017_v38  ;;  %2032 = vpow2.f32 %v2497_v23  ;;  %v1518_v35 = vsel %vm1446_vm3, %v1483_v14, 0.0 }
 0x1fd   : > { %1454 = vst.msk [vmem:[%s2503_s24 + $0x38] sm:$0xff] %vm1446_vm3, %v1421_v39  ;;  %v1387_v30 = vadd.f32 %v1355_v44, %v991_v34  ;;  %2034 = vpow2.f32 %v2523_v41  ;;  %v921_v23 = vadd.f32 %v2425_v22, %v2514_v36  ;;  %v1485_v55 = vmul.f32 %v1420_v15, %v1420_v15 }
 0x1fe   : > { %v2021_v52 = vpop.eup %2020  ;;  %v1517_v56 = vadd.f32 %v1516_v49, %v1515_v50  ;;  %2036 = vrcp.f32 %v1123_v51  ;;  %v2605_v59 = vpop.f32.mrb[24].mxu1  ;;  %v1486_v4 = vmul.f32 %v1421_v39, %v1421_v39  ;;  %v1282_v13 = vmul.f32 1.442695, %v1232_v58 }
 0x1ff   : > { %v2607_v60 = vpop.eup %2022  ;;  %v1419_v61 = vadd.f32 %v1387_v30, %v2549_v0  ;;  %v1360_v41 = vmul.f32 %v2021_v52, %v2468_v54  ;;  %2038 = vpow2.f32 %v2530_v46  ;;  %v2612_v63 = vpop.f32.mrb[25].mxu1  ;;  %v1762_v1 = vmul.f32 -1.442695, %v921_v23 }
 0x200   : > { %v2025_v2 = vpop.eup %2024  ;;  %v1519_v3 = vadd.f32 %v1518_v35, %v1517_v56  ;;  %2040 = vpow2.f32 %v1276_v11  ;;  %v2614_v5 = vpop.f32.mrb[26].mxu1  ;;  %v1230_v11 = vmul.f32 %v2430_v42, %v921_v23  ;;  %v932_v10 = vadd.f32 %v2525_v43, %v2425_v22  ;;  %v997_v43 = vld [vmem:[%s2931_s5 + $0x58] sm:$0xff]  ;;  %v995_v35 = vld [vmem:[%s2931_s5 + $0x48] sm:$0xff] }
 0x201   : > { %1452 = vst.msk [vmem:[%s2503_s24 + $0x28] sm:$0xff] %vm1446_vm3, %v1419_v61  ;;  %v1484_v36 = vmul.f32 %v1419_v61, %v1419_v61  ;;  %v1392_v6 = vadd.f32 %v1360_v41, %v996_v57  ;;  %v1128_v8 = vadd.f32 1.0, %v2025_v2  ;;  %2042 = vpow2.f32 %v2540_v53  ;;  %v2619_v0 = vpop.f32.mrb[27].mxu1 }
 0x202   : > { %v2027_v46 = vpop.eup %2026  ;;  %v1522_v18 = vsel %vm1446_vm3, %v1485_v55, 0.0  ;;  %v1765_v21 = vmul.f32 -1.442695, %v932_v10  ;;  %v1278_v7 = vmul.f32 1.442695, %v1230_v11  ;;  %v924_v27 = vadd.f32 %v2425_v22, %v2532_v48 }
 0x203   : > { %v1520_v15 = vsel %vm1446_vm3, %v1484_v36, 0.0  ;;  %v1424_v16 = vadd.f32 %v1392_v6, %v1324_v45  ;;  %v1358_v53 = vmul.f32 %v2027_v46, %v2468_v54  ;;  %2044 = vrcp.f32 %v1128_v8  ;;  %v2029_v19 = vpop.eup %2028 }
 0x204   : > { %v1521_v20 = vadd.f32 %v1520_v15, %v1519_v3  ;;  %2046 = vpow2.f32 %v1764_v62  ;;  %v1233_v34 = vmul.f32 %v2430_v42, %v932_v10  ;;  %v1524_v39 = vsel %vm1446_vm3, %v1486_v4, 0.0 }
 0x205   : > { %v2031_v25 = vpop.eup %2030  ;;  %1457 = vst.msk [vmem:[%s2503_s24 + $0x50] sm:$0xff] %vm1446_vm3, %v1424_v16  ;;  %v1390_v26 = vadd.f32 %v1358_v53, %v994_v9  ;;  %2048 = vpow2.f32 %v2575_v28  ;;  %v1325_v50 = vmul.f32 %v2590_v47, %v2453_v33  ;;  %v1763_v41 = vmul.f32 -1.442695, %v924_v27  ;;  %v1000_v9 = vld [vmem:[%s2931_s5 + $0x70] sm:$0xff] }
 0x206   : > { %v2033_v31 = vpop.eup %2032  ;;  %v1523_v32 = vadd.f32 %v1522_v18, %v1521_v20  ;;  %v1361_v14 = vmul.f32 %v2031_v25, %v2468_v54  ;;  %2050 = vpow2.f32 %v1762_v1  ;;  %v2640_v37 = vpop.f32.mrb[28].mxu1  ;;  %v1284_v57 = vmul.f32 1.442695, %v1233_v34 }
 0x207   : > { %v2642_v38 = vpop.eup %2034  ;;  %v1422_v44 = vadd.f32 %v1390_v26, %v1322_v40  ;;  %v1126_v28 = vadd.f32 1.0, %v2033_v31  ;;  %2052 = vpow2.f32 %v1282_v13  ;;  %v2645_v45 = vpop.f32.mrb[29].mxu1  ;;  %v1323_v55 = vmul.f32 %v2607_v60, %v2453_v33 }
 0x208   : > { %v2037_v48 = vpop.eup %2036  ;;  %v1525_v49 = vadd.f32 %v1524_v39, %v1523_v32  ;;  %v1393_v51 = vadd.f32 %v1361_v14, %v997_v43  ;;  %2054 = vpow2.f32 %v1765_v21  ;;  %v2652_v30 = vpop.f32.mrb[30].mxu1  ;;  %v1489_v4 = vmul.f32 %v1424_v16, %v1424_v16 }
 0x209   : > { %v2039_v52 = vpop.eup %2038  ;;  %1455 = vst.msk [vmem:[%s2503_s24 + $0x40] sm:$0xff] %vm1446_vm3, %v1422_v44  ;;  %v1487_v40 = vmul.f32 %v1422_v44, %v1422_v44  ;;  %v1359_v56 = vmul.f32 %v2037_v48, %v2468_v54  ;;  %2056 = vrcp.f32 %v1126_v28  ;;  %v2657_v58 = vpop.f32.mrb[31].mxu1  ;;  %v1328_v13 = vmul.f32 %v2029_v19, %v2453_v33  ;;  %v998_v28 = vld [vmem:[%s2931_s5 + $0x60] sm:$0xff] }
 0x20a   : > { %v2659_v47 = vpop.eup %2040  ;;  %v1425_v23 = vadd.f32 %v1393_v51, %v1325_v50  ;;  %v1129_v61 = vadd.f32 1.0, %v2039_v52  ;;  %2058 = vpow2.f32 %v1278_v7  ;;  %v1231_v11 = vmul.f32 %v2430_v42, %v924_v27 }
 0x20b   : > { %v2043_v62 = vpop.eup %2042  ;;  %v1526_v2 = vsel %vm1446_vm3, %v1487_v40, 0.0  ;;  %v1391_v3 = vadd.f32 %v1359_v56, %v995_v35  ;;  %2060 = vpow2.f32 %v1284_v57  ;;  %v945_v10 = vadd.f32 %v2559_v12, %v2425_v22 }
 0x20c   : > { %v1527_v36 = vadd.f32 %v1526_v2, %v1525_v49  ;;  %1458 = vst.msk [vmem:[%s2503_s24 + $0x58] sm:$0xff] %vm1446_vm3, %v1425_v23  ;;  %2062 = vrcp.f32 %v1129_v61  ;;  %v1127_v6 = vadd.f32 1.0, %v2043_v62  ;;  %v1490_v16 = vmul.f32 %v1425_v23, %v1425_v23  ;;  %v1001_v62 = vld [vmem:[%s2931_s5 + $0x78] sm:$0xff] }
 0x20d   : > { %v2045_v8 = vpop.eup %2044  ;;  %v1423_v46 = vadd.f32 %v1391_v3, %v1323_v55  ;;  %2064 = vpow2.f32 %v1763_v41  ;;  %v937_v20 = vadd.f32 %v2425_v22, %v2566_v17  ;;  %v1530_v21 = vsel %vm1446_vm3, %v1489_v4, 0.0 }
 0x20e   : > { %v2047_v1 = vpop.eup %2046  ;;  %v1364_v60 = vmul.f32 %v2045_v8, %v2468_v54  ;;  %2066 = vrcp.f32 %v1127_v6  ;;  %v1768_v26 = vmul.f32 -1.442695, %v945_v10  ;;  %v1236_v43 = vmul.f32 %v2430_v42, %v945_v10  ;;  %v999_v8 = vld [vmem:[%s2931_s5 + $0x68] sm:$0xff] }
 0x20f   : > { %v2049_v15 = vpop.eup %2048  ;;  %1456 = vst.msk [vmem:[%s2503_s24 + $0x48] sm:$0xff] %vm1446_vm3, %v1423_v46  ;;  %v1488_v53 = vmul.f32 %v1423_v46, %v1423_v46  ;;  %v1132_v18 = vadd.f32 1.0, %v2047_v1  ;;  %v1766_v31 = vmul.f32 -1.442695, %v937_v20  ;;  %v1326_v17 = vmul.f32 %v2642_v38, %v2453_v33 }
 0x210   : > { %v2051_v19 = vpop.eup %2050  ;;  %v1396_v25 = vadd.f32 %v1364_v60, %v1000_v9  ;;  %v1532_v44 = vsel %vm1446_vm3, %v1490_v16, 0.0  ;;  %v1280_v49 = vmul.f32 1.442695, %v1231_v11  ;;  %v1290_v52 = vmul.f32 1.442695, %v1236_v43 }
 0x211   : > { %v2053_v7 = vpop.eup %2052  ;;  %v1528_v27 = vsel %vm1446_vm3, %v1488_v53, 0.0  ;;  %2068 = vrcp.f32 %v1132_v18  ;;  %v1130_v12 = vadd.f32 1.0, %v2051_v19  ;;  %v1234_v40 = vmul.f32 %v2430_v42, %v937_v20  ;;  %v1004_v18 = vld [vmem:[%s2931_s5 + $0x90] sm:$0xff] }
 0x212   : > { %v2055_v32 = vpop.eup %2054  ;;  %v1529_v14 = vadd.f32 %v1528_v27, %v1527_v36  ;;  %v1428_v34 = vadd.f32 %v1396_v25, %v1328_v13  ;;  %2070 = vpow2.f32 %v1768_v26  ;;  %v948_v56 = vadd.f32 %v2570_v24, %v2425_v22 }
 0x213   : > { %v2057_v39 = vpop.eup %2056  ;;  %2072 = vrcp.f32 %v1130_v12  ;;  %v1133_v48 = vadd.f32 1.0, %v2055_v32  ;;  %v940_v57 = vadd.f32 %v2425_v22, %v2577_v29  ;;  %v1329_v2 = vmul.f32 %v2659_v47, %v2453_v33 }
 0x214   : > { %v2059_v50 = vpop.eup %2058  ;;  %v1531_v51 = vadd.f32 %v1530_v21, %v1529_v14  ;;  %1461 = vst.msk [vmem:[%s2503_s24 + $0x70] sm:$0xff] %vm1446_vm3, %v1428_v34  ;;  %v1362_v35 = vmul.f32 %v2057_v39, %v2468_v54  ;;  %2074 = vpow2.f32 %v1766_v31  ;;  %v1327_v55 = vmul.f32 %v2049_v15, %v2453_v33  ;;  %v1002_v31 = vld [vmem:[%s2931_s5 + $0x80] sm:$0xff] }
 0x215   : > { %v2061_v38 = vpop.eup %2060  ;;  %2076 = vrcp.f32 %v1133_v48  ;;  %v1332_v24 = vmul.f32 %v2053_v7, %v2453_v33  ;;  %v1769_v29 = vmul.f32 -1.442695, %v948_v56  ;;  %v1767_v9 = vmul.f32 -1.442695, %v940_v57  ;;  %v1005_v48 = vld [vmem:[%s2931_s5 + $0x98] sm:$0xff] }
 0x216   : > { %v2063_v23 = vpop.eup %2062  ;;  %v1394_v61 = vadd.f32 %v1362_v35, %v998_v28  ;;  %v1533_v41 = vadd.f32 %v1532_v44, %v1531_v51  ;;  %2078 = vpow2.f32 %v1280_v49  ;;  %v1286_v1 = vmul.f32 1.442695, %v1234_v40 }
 0x217   : > { %v2065_v3 = vpop.eup %2064  ;;  %v1365_v4 = vmul.f32 %v2063_v23, %v2468_v54  ;;  %2080 = vpow2.f32 %v1290_v52  ;;  %v1493_v60 = vmul.f32 %v1428_v34, %v1428_v34  ;;  %v1330_v10 = vmul.f32 %v2059_v50, %v2453_v33 }
 0x218   : > { %v2067_v36 = vpop.eup %2066  ;;  %v1426_v6 = vadd.f32 %v1394_v61, %v1326_v17  ;;  %v1131_v46 = vadd.f32 1.0, %v2065_v3  ;;  %2082 = vpow2.f32 %v1769_v29  ;;  %v1237_v20 = vmul.f32 %v2430_v42, %v948_v56 }
 0x219   : > { %v1397_v47 = vadd.f32 %v1365_v4, %v1001_v62  ;;  %v1363_v13 = vmul.f32 %v2067_v36, %v2468_v54  ;;  %v961_v19 = vadd.f32 %v2605_v59, %v2425_v22  ;;  %v1333_v43 = vmul.f32 %v2061_v38, %v2453_v33 }
 0x21a   : > { %1459 = vst.msk [vmem:[%s2503_s24 + $0x60] sm:$0xff] %vm1446_vm3, %v1426_v6  ;;  %v1491_v11 = vmul.f32 %v1426_v6, %v1426_v6  ;;  %2084 = vrcp.f32 %v1131_v46  ;;  %v1235_v17 = vmul.f32 %v2430_v42, %v940_v57  ;;  %v1292_v50 = vmul.f32 1.442695, %v1237_v20  ;;  %v1003_v6 = vld [vmem:[%s2931_s5 + $0x88] sm:$0xff] }
 0x21b   : > { %v2069_v15 = vpop.eup %2068  ;;  %v1429_v16 = vadd.f32 %v1397_v47, %v1329_v2  ;;  %v1395_v53 = vadd.f32 %v1363_v13, %v999_v8  ;;  %2086 = vpow2.f32 %v1767_v9  ;;  %v1772_v39 = vmul.f32 -1.442695, %v961_v19 }
 0x21c   : > { %v2071_v21 = vpop.eup %2070  ;;  %v1534_v25 = vsel %vm1446_vm3, %v1491_v11, 0.0  ;;  %v1368_v26 = vmul.f32 %v2069_v15, %v2468_v54  ;;  %2088 = vpow2.f32 %v1286_v1  ;;  %v953_v57 = vadd.f32 %v2425_v22, %v2612_v63 }
 0x21d   : > { %v2073_v7 = vpop.eup %2072  ;;  %v1535_v27 = vadd.f32 %v1534_v25, %v1533_v41  ;;  %1462 = vst.msk [vmem:[%s2503_s24 + $0x78] sm:$0xff] %vm1446_vm3, %v1429_v16  ;;  %v1427_v12 = vadd.f32 %v1395_v53, %v1327_v55  ;;  %v1136_v32 = vadd.f32 1.0, %v2071_v21  ;;  %v1494_v40 = vmul.f32 %v1429_v16, %v1429_v16 }
 0x21e   : > { %v2075_v59 = vpop.eup %2074  ;;  %v1400_v14 = vadd.f32 %v1368_v26, %v1004_v18  ;;  %v1366_v34 = vmul.f32 %v2073_v7, %v2468_v54  ;;  %v1288_v2 = vmul.f32 1.442695, %v1235_v17  ;;  %v1538_v3 = vsel %vm1446_vm3, %v1493_v60, 0.0  ;;  %v1008_v26 = vld [vmem:[%s2931_s5 + $0xb0] sm:$0xff] }
 0x21f   : > { %v2077_v44 = vpop.eup %2076  ;;  %1460 = vst.msk [vmem:[%s2503_s24 + $0x68] sm:$0xff] %vm1446_vm3, %v1427_v12  ;;  %v1492_v28 = vmul.f32 %v1427_v12, %v1427_v12  ;;  %2090 = vrcp.f32 %v1136_v32  ;;  %v1134_v49 = vadd.f32 1.0, %v2075_v59  ;;  %v1240_v4 = vmul.f32 %v2430_v42, %v961_v19 }
 0x220   : > { %v1432_v51 = vadd.f32 %v1400_v14, %v1332_v24  ;;  %v1398_v35 = vadd.f32 %v1366_v34, %v1002_v31  ;;  %v1369_v52 = vmul.f32 %v2077_v44, %v2468_v54  ;;  %2092 = vpow2.f32 %v1772_v39  ;;  %v2079_v38 = vpop.eup %2078  ;;  %v1006_v14 = vld [vmem:[%s2931_s5 + $0xa0] sm:$0xff] }
 0x221   : > { %v1536_v56 = vsel %vm1446_vm3, %v1492_v28, 0.0  ;;  %2094 = vrcp.f32 %v1134_v49  ;;  %v2081_v23 = vpop.eup %2080  ;;  %v1770_v8 = vmul.f32 -1.442695, %v953_v57  ;;  %v1540_v46 = vsel %vm1446_vm3, %v1494_v40, 0.0 }
 0x222   : > { %v1537_v61 = vadd.f32 %v1536_v56, %v1535_v27  ;;  %1465 = vst.msk [vmem:[%s2503_s24 + $0x90] sm:$0xff] %vm1446_vm3, %v1432_v51  ;;  %v1430_v41 = vadd.f32 %v1398_v35, %v1330_v10  ;;  %v1401_v62 = vadd.f32 %v1369_v52, %v1005_v48  ;;  %v2083_v55 = vpop.eup %2082  ;;  %2096 = vpow2.f32 %v1292_v50 }
 0x223   : > { %v1137_v47 = vadd.f32 1.0, %v2083_v55  ;;  %v1331_v11 = vmul.f32 %v2079_v38, %v2453_v33  ;;  %2098 = vpow2.f32 %v1288_v2  ;;  %v1298_v53 = vmul.f32 1.442695, %v1240_v4  ;;  %v1009_v55 = vld [vmem:[%s2931_s5 + $0xb8] sm:$0xff] }
 0x224   : > { %v2085_v24 = vpop.eup %2084  ;;  %v1539_v29 = vadd.f32 %v1538_v3, %v1537_v61  ;;  %1463 = vst.msk [vmem:[%s2503_s24 + $0x80] sm:$0xff] %vm1446_vm3, %v1430_v41  ;;  %v1495_v36 = vmul.f32 %v1430_v41, %v1430_v41  ;;  %v1433_v63 = vadd.f32 %v1401_v62, %v1333_v43  ;;  %v964_v20 = vadd.f32 %v2614_v5, %v2425_v22  ;;  %v2784_v3 = vld [vmem:[%s2932_s6] ss:$0 sm:$0xff] }
 0x225   : > { %v1367_v9 = vmul.f32 %v2085_v24, %v2468_v54  ;;  %v2087_v13 = vpop.eup %2086  ;;  %2100 = vrcp.f32 %v1137_v47  ;;  %v1497_v21 = vmul.f32 %v1432_v51, %v1432_v51  ;;  %v956_v43 = vadd.f32 %v2425_v22, %v2619_v0 }
 0x226   : > { %v1541_v1 = vadd.f32 %v1540_v46, %v1539_v29  ;;  %v1542_v60 = vsel %vm1446_vm3, %v1495_v36, 0.0  ;;  %1466 = vst.msk [vmem:[%s2503_s24 + $0x98] sm:$0xff] %vm1446_vm3, %v1433_v63  ;;  %v2089_v10 = vpop.eup %2088  ;;  %v1135_v16 = vadd.f32 1.0, %v2087_v13  ;;  %2102 = vpow2.f32 %v1770_v8 }
 0x227   : > { %v1399_v15 = vadd.f32 %v1367_v9, %v1003_v6  ;;  %v1336_v27 = vmul.f32 %v2081_v23, %v2453_v33  ;;  %v1334_v31 = vmul.f32 %v2089_v10, %v2453_v33  ;;  %v1773_v32 = vmul.f32 -1.442695, %v964_v20  ;;  %v1007_v6 = vld [vmem:[%s2931_s5 + $0xa8] sm:$0xff]  ;;  %v2151_v9 = vld [vmem:[%s2930_s4] ss:$0 sm:$0xff] }
 0x228   : > { %v1543_v18 = vadd.f32 %v1542_v60, %v1541_v1  ;;  %2104 = vrcp.f32 %v1135_v16  ;;  %v1771_v17 = vmul.f32 -1.442695, %v956_v43  ;;  %v1238_v44 = vmul.f32 %v2430_v42, %v953_v57 }
 0x229   : > { %v2091_v19 = vpop.eup %2090  ;;  %v1431_v25 = vadd.f32 %v1399_v15, %v1331_v11  ;;  %2106 = vpow2.f32 %v1298_v53  ;;  %v1498_v48 = vmul.f32 %v1433_v63, %v1433_v63  ;;  %v977_v50 = vadd.f32 %v2640_v37, %v2425_v22 }
 0x22a   : > { %v2093_v7 = vpop.eup %2092  ;;  %v1372_v12 = vmul.f32 %v2091_v19, %v2468_v54  ;;  %2108 = vpow2.f32 %v1773_v32  ;;  %v1546_v51 = vsel %vm1446_vm3, %v1497_v21, 0.0  ;;  %v1241_v40 = vmul.f32 %v2430_v42, %v964_v20  ;;  %v1012_v21 = vld [vmem:[%s2931_s5 + $0xd0] sm:$0xff] }
 0x22b   : > { %v2095_v5 = vpop.eup %2094  ;;  %1464 = vst.msk [vmem:[%s2503_s24 + $0x88] sm:$0xff] %vm1446_vm3, %v1431_v25  ;;  %v1496_v59 = vmul.f32 %v1431_v25, %v1431_v25  ;;  %v1140_v34 = vadd.f32 1.0, %v2093_v7  ;;  %v1776_v56 = vmul.f32 -1.442695, %v977_v50  ;;  %v969_v57 = vadd.f32 %v2425_v22, %v2645_v45 }
 0x22c   : > { %v1404_v0 = vadd.f32 %v1372_v12, %v1008_v26  ;;  %v1370_v39 = vmul.f32 %v2095_v5, %v2468_v54  ;;  %v2097_v28 = vpop.eup %2096  ;;  %v1294_v62 = vmul.f32 1.442695, %v1238_v44  ;;  %v1548_v2 = vsel %vm1446_vm3, %v1498_v48, 0.0 }
 0x22d   : > { %v1544_v49 = vsel %vm1446_vm3, %v1496_v59, 0.0  ;;  %2110 = vrcp.f32 %v1140_v34  ;;  %v2099_v23 = vpop.eup %2098  ;;  %v1337_v42 = vmul.f32 %v2097_v28, %v2453_v33  ;;  %v1239_v22 = vmul.f32 %v2784_v3, %v956_v43 }
 0x22e   : > { %v1545_v35 = vadd.f32 %v1544_v49, %v1543_v18  ;;  %v1436_v52 = vadd.f32 %v1404_v0, %v1336_v27  ;;  %v1402_v38 = vadd.f32 %v1370_v39, %v1006_v14  ;;  %2112 = vpow2.f32 %v1771_v17 }
 0x22f   : > { %v2101_v37 = vpop.eup %2100  ;;  %v1774_v36 = vmul.f32 -1.442695, %v969_v57  ;;  %v1300_v46 = vmul.f32 1.442695, %v1241_v40  ;;  %2114 = vpow2.f32 %v1776_v56  ;;  %v980_v47 = vadd.f32 %v2151_v9, %v2652_v30  ;;  %v1010_v40 = vld [vmem:[%s2931_s5 + $0xc0] sm:$0xff] }
 0x230   : > { %v1547_v61 = vadd.f32 %v1546_v51, %v1545_v35  ;;  %1469 = vst.msk [vmem:[%s2503_s24 + $0xb0] sm:$0xff] %vm1446_vm3, %v1436_v52  ;;  %v1434_v41 = vadd.f32 %v1402_v38, %v1334_v31  ;;  %v2103_v45 = vpop.eup %2102  ;;  %v1373_v29 = vmul.f32 %v2101_v37, %v2468_v54  ;;  %2116 = vpow2.f32 %v1294_v62 }
 0x231   : > { %v1138_v8 = vadd.f32 1.0, %v2103_v45  ;;  %v1335_v15 = vmul.f32 %v2099_v23, %v2453_v33  ;;  %v1777_v16 = vmul.f32 -1.442695, %v980_v47  ;;  %v1296_v19 = vmul.f32 1.442695, %v1239_v22 }
 0x232   : > { %1467 = vst.msk [vmem:[%s2503_s24 + $0xa0] sm:$0xff] %vm1446_vm3, %v1434_v41  ;;  %v1499_v4 = vmul.f32 %v1434_v41, %v1434_v41  ;;  %v1549_v24 = vadd.f32 %v1548_v2, %v1547_v61  ;;  %v2105_v63 = vpop.eup %2104  ;;  %v1405_v1 = vadd.f32 %v1373_v29, %v1009_v55  ;;  %v1244_v26 = vmul.f32 %v2784_v3, %v977_v50 }
 0x233   : > { %v1371_v60 = vmul.f32 %v2105_v63, %v2468_v54  ;;  %v2107_v11 = vpop.eup %2106  ;;  %2118 = vrcp.f32 %v1138_v8  ;;  %v972_v43 = vadd.f32 %v2151_v9, %v2657_v58  ;;  %v1501_v31 = vmul.f32 %v1436_v52, %v1436_v52 }
 0x234   : > { %v1550_v13 = vsel %vm1446_vm3, %v1499_v4, 0.0  ;;  %v2109_v53 = vpop.eup %2108  ;;  %v1437_v18 = vadd.f32 %v1405_v1, %v1337_v42  ;;  %2120 = vpow2.f32 %v1774_v36  ;;  %v1340_v32 = vmul.f32 %v2107_v11, %v2453_v33  ;;  %v2826_v42 = vld [vmem:[%s2932_s6 + $0x1] ss:$0 sm:$0xff] }
 0x235   : > { %v1551_v10 = vadd.f32 %v1550_v13, %v1549_v24  ;;  %v1403_v20 = vadd.f32 %v1371_v60, %v1007_v6  ;;  %v1141_v25 = vadd.f32 1.0, %v2109_v53  ;;  %2122 = vpow2.f32 %v1300_v46  ;;  %v1013_v24 = vld [vmem:[%s2931_s5 + $0xd8] sm:$0xff]  ;;  %v1011_v13 = vld [vmem:[%s2931_s5 + $0xc8] sm:$0xff] }
 0x236   : > { %1470 = vst.msk [vmem:[%s2503_s24 + $0xb8] sm:$0xff] %vm1446_vm3, %v1437_v18  ;;  %2124 = vpow2.f32 %v1777_v16  ;;  %v1775_v5 = vmul.f32 -1.442695, %v972_v43  ;;  %v1242_v58 = vmul.f32 %v2784_v3, %v969_v57  ;;  %v1306_v17 = vmul.f32 1.442695, %v1244_v26 }
 0x237   : > { %v2111_v30 = vpop.eup %2110  ;;  %v1435_v7 = vadd.f32 %v1403_v20, %v1335_v15  ;;  %2126 = vrcp.f32 %v1141_v25  ;;  %v1245_v0 = vmul.f32 %v2784_v3, %v980_v47  ;;  %v1502_v39 = vmul.f32 %v1437_v18, %v1437_v18 }
 0x238   : > { %v1376_v27 = vmul.f32 %v2111_v30, %v2468_v54  ;;  %v2113_v12 = vpop.eup %2112  ;;  %2128 = vpow2.f32 %v1296_v19  ;;  %v1554_v50 = vsel %vm1446_vm3, %v1501_v31, 0.0  ;;  %v1302_v35 = vmul.f32 1.442695, %v1242_v58  ;;  %v1016_v30 = vld [vmem:[%s2931_s5 + $0xf0] sm:$0xff] }
 0x239   : > { %1468 = vst.msk [vmem:[%s2503_s24 + $0xa8] sm:$0xff] %vm1446_vm3, %v1435_v7  ;;  %v1500_v59 = vmul.f32 %v1435_v7, %v1435_v7  ;;  %v1139_v34 = vadd.f32 1.0, %v2113_v12  ;;  %v2115_v33 = vpop.eup %2114  ;;  %v1556_v57 = vsel %vm1446_vm3, %v1502_v39, 0.0  ;;  %v1308_v61 = vmul.f32 1.442695, %v1245_v0  ;;  %v1017_v0 = vld [vmem:[%s2931_s5 + $0xf8] sm:$0xff] }
 0x23a   : > { %v1408_v14 = vadd.f32 %v1376_v27, %v1012_v21  ;;  %v2117_v49 = vpop.eup %2116  ;;  %v1144_v51 = vadd.f32 1.0, %v2115_v33  ;;  %v1243_v2 = vmul.f32 %v2784_v3, %v972_v43 }
 0x23b   : > { %v1552_v44 = vsel %vm1446_vm3, %v1500_v59, 0.0  ;;  %2130 = vrcp.f32 %v1139_v34  ;;  %v1338_v22 = vmul.f32 %v2826_v42, %v2117_v49 }
 0x23c   : > { %v1440_v28 = vadd.f32 %v1408_v14, %v1340_v32  ;;  %v1553_v48 = vadd.f32 %v1552_v44, %v1551_v10  ;;  %2132 = vpow2.f32 %v1775_v5  ;;  %v1304_v6 = vmul.f32 1.442695, %v1243_v2  ;;  %v1014_v32 = vld [vmem:[%s2931_s5 + $0xe0] sm:$0xff] }
 0x23d   : > { %v2119_v52 = vpop.eup %2118  ;;  %2134 = vpow2.f32 %v1306_v17 }
 0x23e   : > { %1473 = vst.msk [vmem:[%s2503_s24 + $0xd0] sm:$0xff] %vm1446_vm3, %v1440_v28  ;;  %v1555_v38 = vadd.f32 %v1554_v50, %v1553_v48  ;;  %v2121_v56 = vpop.eup %2120  ;;  %v1374_v23 = vmul.f32 %v2119_v52, %v2468_v54  ;;  %2136 = vrcp.f32 %v1144_v51  ;;  %v1505_v7 = vmul.f32 %v1440_v28, %v1440_v28 }
 0x23f   : > { %v2123_v41 = vpop.eup %2122  ;;  %v1142_v37 = vadd.f32 1.0, %v2121_v56  ;;  %2138 = vpow2.f32 %v1302_v35 }
 0x240   : > { %v1557_v62 = vadd.f32 %v1556_v57, %v1555_v38  ;;  %v2125_v55 = vpop.eup %2124  ;;  %v1406_v45 = vadd.f32 %v1374_v23, %v1010_v40  ;;  %v1341_v9 = vmul.f32 %v2826_v42, %v2123_v41  ;;  %v1562_v48 = vsel %vm1446_vm3, %v1505_v7, 0.0  ;;  %v1015_v23 = vld [vmem:[%s2931_s5 + $0xe8] sm:$0xff] }
 0x241   : > { %v2127_v4 = vpop.eup %2126  ;;  %2140 = vrcp.f32 %v1142_v37  ;;  %v1145_v29 = vadd.f32 1.0, %v2125_v55 }
 0x242   : > { %v1438_v36 = vadd.f32 %v1406_v45, %v1338_v22  ;;  %v1377_v3 = vmul.f32 %v2127_v4, %v2468_v54  ;;  %2142 = vpow2.f32 %v1308_v61  ;;  %v2129_v63 = vpop.eup %2128  ;;  %v2153_v54 = vld [vmem:[%s2932_s6 + $0x2] ss:$0 sm:$0xff] }
 0x243   : > { %2144 = vrcp.f32 %v1145_v29  ;;  %v1339_v18 = vmul.f32 %v2826_v42, %v2129_v63 }
 0x244   : > { %1471 = vst.msk [vmem:[%s2503_s24 + $0xc0] sm:$0xff] %vm1446_vm3, %v1438_v36  ;;  %v1503_v46 = vmul.f32 %v1438_v36, %v1438_v36  ;;  %v1409_v47 = vadd.f32 %v1377_v3, %v1013_v24  ;;  %2146 = vpow2.f32 %v1304_v6 }
 0x245   : > { %v2131_v8 = vpop.eup %2130 }
 0x246   : > { %v2133_v1 = vpop.eup %2132  ;;  %v1375_v60 = vmul.f32 %v2153_v54, %v2131_v8  ;;  %v1558_v11 = vsel %vm1446_vm3, %v1503_v46, 0.0  ;;  %v1441_v10 = vadd.f32 %v1409_v47, %v1341_v9 }
 0x247   : > { %v1143_v15 = vadd.f32 1.0, %v2133_v1  ;;  %v2135_v16 = vpop.eup %2134  ;;  %v1559_v53 = vadd.f32 %v1558_v11, %v1557_v62 }
 0x248   : > { %v1407_v20 = vadd.f32 %v1375_v60, %v1011_v13  ;;  %v2137_v19 = vpop.eup %2136  ;;  %1474 = vst.msk [vmem:[%s2503_s24 + $0xd8] sm:$0xff] %vm1446_vm3, %v1441_v10  ;;  %v1344_v12 = vmul.f32 %v2826_v42, %v2135_v16  ;;  %v1506_v34 = vmul.f32 %v1441_v10, %v1441_v10 }
 0x249   : > { %2148 = vrcp.f32 %v1143_v15  ;;  %v1380_v25 = vmul.f32 %v2153_v54, %v2137_v19  ;;  %v2139_v26 = vpop.eup %2138 }
 0x24a   : > { %v1439_v21 = vadd.f32 %v1407_v20, %v1339_v18  ;;  %v1342_v44 = vmul.f32 %v2826_v42, %v2139_v26  ;;  %v1564_v38 = vsel %vm1446_vm3, %v1506_v34, 0.0 }
 0x24b   : > { %v2141_v43 = vpop.eup %2140  ;;  %v1412_v31 = vadd.f32 %v1380_v25, %v1016_v30 }
 0x24c   : > { %1472 = vst.msk [vmem:[%s2503_s24 + $0xc8] sm:$0xff] %vm1446_vm3, %v1439_v21  ;;  %v1504_v27 = vmul.f32 %v1439_v21, %v1439_v21  ;;  %v2143_v5 = vpop.eup %2142  ;;  %v1378_v59 = vmul.f32 %v2153_v54, %v2141_v43 }
 0x24d   : > { %v2145_v14 = vpop.eup %2144  ;;  %v1444_v17 = vadd.f32 %v1412_v31, %v1344_v12  ;;  %v1345_v51 = vmul.f32 %v2826_v42, %v2143_v5 }
 0x24e   : > { %v1560_v58 = vsel %vm1446_vm3, %v1504_v27, 0.0  ;;  %v1410_v28 = vadd.f32 %v1378_v59, %v1014_v32  ;;  %v1381_v33 = vmul.f32 %v2153_v54, %v2145_v14  ;;  %v2147_v52 = vpop.eup %2146 }
 0x24f   : > { %v1561_v39 = vadd.f32 %v1560_v58, %v1559_v53  ;;  %1477 = vst.msk [vmem:[%s2503_s24 + $0xf0] sm:$0xff] %vm1446_vm3, %v1444_v17  ;;  %v1343_v37 = vmul.f32 %v2826_v42, %v2147_v52  ;;  %v1509_v45 = vmul.f32 %v1444_v17, %v1444_v17 }
 0x250   : > { %v1442_v50 = vadd.f32 %v1410_v28, %v1342_v44  ;;  %v1413_v35 = vadd.f32 %v1381_v33, %v1017_v0 }
 0x251   : > { %v1563_v49 = vadd.f32 %v1562_v48, %v1561_v39  ;;  %v1570_v3 = vsel %vm1446_vm3, %v1509_v45, 0.0 }
 0x252   : > { %1475 = vst.msk [vmem:[%s2503_s24 + $0xe0] sm:$0xff] %vm1446_vm3, %v1442_v50  ;;  %v1507_v56 = vmul.f32 %v1442_v50, %v1442_v50  ;;  %v1445_v57 = vadd.f32 %v1413_v35, %v1345_v51 }
 0x253   : > { %v2149_v40 = vpop.eup %2148  ;;  %v1565_v61 = vadd.f32 %v1564_v38, %v1563_v49 }
 0x254   : > { %v1379_v41 = vmul.f32 %v2153_v54, %v2149_v40  ;;  %v1566_v62 = vsel %vm1446_vm3, %v1507_v56, 0.0  ;;  %1478 = vst.msk [vmem:[%s2503_s24 + $0xf8] sm:$0xff] %vm1446_vm3, %v1445_v57  ;;  %v1510_v24 = vmul.f32 %v1445_v57, %v1445_v57 }
 0x255   : > { %v1567_v55 = vadd.f32 %v1566_v62, %v1565_v61 }
 0x256   : > { %v1411_v2 = vadd.f32 %v1379_v41, %v1015_v23  ;;  %v1572_v6 = vsel %vm1446_vm3, %v1510_v24, 0.0 }
 0x258   : > { %v1443_v22 = vadd.f32 %v1411_v2, %v1343_v37 }
 0x25a   : > { %1476 = vst.msk [vmem:[%s2503_s24 + $0xe8] sm:$0xff] %vm1446_vm3, %v1443_v22  ;;  %v1508_v4 = vmul.f32 %v1443_v22, %v1443_v22  ;;  %s1603_s24 = sshll.u32 %s305_s23, 4  ;;  %s2886_s24 = int_to_ptr.vmem [resolvable:$true] %s1603_s24 }
 0x25b   : > { %s2154_s12 = scalar_lea.vmem %s2886_s24, 16  ;;  %p2161_p0 = scmp.lt.s32.totalorder %s2886_s24, %s2159_s13 }
 0x25c   : > { %v1568_v29 = vsel %vm1446_vm3, %v1508_v4, 0.0  ;;  %p2155_p11 = scmp.ne.s32.totalorder %s2886_s24, %s2154_s12  ;;  %p2162_p1 = scmp.lt.s32.totalorder %s2160_s17, %s2154_s12 }
 0x25d   : > { %v1569_v36 = vadd.f32 %v1568_v29, %v1567_v55 }
 0x25e   : > { %p2156_p12 = pnand %p2155_p11, %p2302_p5  ;;  %p2163_p2 = por %p2162_p1, %p2161_p0 }
 0x25f   : > { %v1571_v63 = vadd.f32 %v1570_v3, %v1569_v36 }
 0x260   : > { %p2157_p13 = pneg %p2156_p12 }
 0x261   : > { %v1573_v8 = vadd.f32 %v1572_v6, %v1571_v63 }
 0x262   : > { %p2164_p3 = pnand %p2163_p2, %p2157_p13 }
 0x263   : > { %v1574_v46 = vrot.slane %v1573_v8, 4 }
 0x265   : > { %v1575_v42 = vadd.f32 %v1574_v46, %v1573_v8 }
 0x267   : > { %v1576_v9 = vrot.slane %v1575_v42, 2 }
 0x269   : > { %v1577_v47 = vadd.f32 %v1576_v9, %v1575_v42 }
 0x26b   : > { %v1578_v13 = vrot.slane %v1577_v47, 1 }
 0x26d   : > { %v1579_v1 = vadd.f32 %v1578_v13, %v1577_v47 }
 0x26f   : > { %1581 = vst.msk [vmem:[%s305_s23] sm:$0x1] %vm1580_vm4, %v1579_v1 }
 0x270   : > { %2167 = shalt.err (!%p2164_p3)
}
 0x271   : > { %s2168_s18 = scalar_lea.hbm %s2884_s26, 16  ;;  %s2172_s21 = scalar_lea.hbm %s2934_s8, 32 }
 0x272   : > { %p2169_p4 = scmp.ne.s32.totalorder %s2884_s26, %s2168_s18  ;;  %p2173_p9 = scmp.lt.u32.totalorder %s2884_s26, %s2934_s8 }
 0x273   : > { %p2174_p10 = scmp.lt.u32.totalorder %s2172_s21, %s2168_s18  ;;  %p2176_p12 = scmp.lt.u32.totalorder %s2168_s18, %s2884_s26 }
 0x274   : > { %p2170_p7 = pnand %p2169_p4, %p2302_p5 }
 0x275   : > { %p2175_p11 = por %p2174_p10, %p2173_p9 }
 0x276   : > { %p2171_p8 = pneg %p2170_p7 }
 0x277   : > { %p2177_p13 = por %p2176_p12, %p2175_p11 }
 0x279   : > { %p2178_p0 = pnand %p2177_p13, %p2171_p8 }
 0x27b   : > { %2181 = shalt.err (!%p2178_p0)
}
 0x27c   : > { %1898 = dma.vmem_to_hbm [thread:$0]  (%p2302_p5), %s2886_s24, 16, %s2884_s26, %s1588_s10  }
 0x27d PF: > { %p1904_p1 = scmp.ge.s32.totalorder %s2216_s30, 2  ;;  %s1623_s25 = sand.u32 1, %s2204_s27  }
 0x27e   : > { %s1624_s12 = scalar_lea.sflag [#allocation3], %s1623_s25 }
 0x27f   : > { %p1901_p2 = pnand %p1904_p1, %p2306_p6 }
 0x281   : > { %2199 = dma.done.wait (!%p1901_p2), %s1624_s12, 16  }
 0x282   : > { %2201 = vsyncadd (!%p1901_p2), %s1624_s12, 4294967280  ;;  %p19_p3 = scmp.ge.s32.totalorder %s2289_s11, 4   ;;  %s2937_s27 = smov %s2208_s28 }
 0x283   : > { %s2938_s28 = smov %s2212_s29  ;;  %s2939_s29 = smov %s2300_s14 }
 0x284   : > { %s2940_s30 = smov %s2289_s11  ;;  %21 = sbr.rel (!%p19_p3) target bundleno = 3 (0x3), region = 95 }
 0x28b   :  { %1628 = vsyncpa [#allocation3], 1 }
 0x28c   :  { %1630 = vsyncpa [#allocation3 + $0x1], 1 }

</bundles_post_ra>
